<compile_context>
chip_gen: v5e
topology: v5e:2x2
jax: 0.10.0
libtpu: 0.0.40
codegen_flags: <defaults>
</compile_context>

<pallas_src>
import math

import jax
import jax.numpy as jnp
from jax import lax
from jax.experimental import pallas as pl
from jax.experimental.pallas import tpu as pltpu
import numpy as np

# ---------------- config (small, ViT-style) ----------------
BATCH = 2
SEQ = 8
HIDDEN = 32
NUM_HEADS = 4
HEAD_DIM = HIDDEN // NUM_HEADS
INTERMEDIATE = 4 * HIDDEN          # ViT-standard 4x hidden
LN_EPS = 1e-12                     # transformers ViTConfig default layer_norm_eps
SCALE = 1.0 / math.sqrt(HEAD_DIM)
INV_SQRT2 = 1.0 / math.sqrt(2.0)

TOKENS = BATCH * SEQ               # rows seen by the kernel (batch folded into rows)
NB = NUM_HEADS * BATCH             # leading batch axis of the batched attention


def _layernorm(v, g, b):
    mu = jnp.mean(v, axis=-1, keepdims=True)
    var = jnp.mean((v - mu) ** 2, axis=-1, keepdims=True)
    return (v - mu) * lax.rsqrt(var + LN_EPS) * g + b


def vit_layer_kernel(
    x_ref,
    ln1g_ref, ln1b_ref,
    wqkv_ref, bqkv_ref,
    woh_ref, bo_ref,
    ln2g_ref, ln2b_ref,
    wi_ref, bi_ref,
    wout_ref, bout_ref,
    out_ref,
):
    x = x_ref[...]                                                     # (T, H), T = B*S

    # ---- layernorm_before ----
    h1 = _layernorm(x, ln1g_ref[...], ln1b_ref[...])

    # ---- fused Q|K|V projection (attention SCALE pre-folded into Q block) ----
    qkv = jnp.dot(h1, wqkv_ref[...],
                  preferred_element_type=jnp.float32) + bqkv_ref[...]  # (T, 3H)

    # ---- head split: one relayout, then pure reshapes / leading-dim slices ----
    # (T, 3*NH*HD) -> (T, 3*NH, HD) -> (3*NH, T, HD); group g = qkv_kind*NH + head.
    qkv_g = pltpu.einshape("tgd->gtd",
                           qkv.reshape(TOKENS, 3 * NUM_HEADS, HEAD_DIM))
    # (NH, B*S, HD) -> (NH*B, S, HD) is a pure row-major reshape (batch idx = n*B + b),
    # so no cross-batch attention can occur.
    q = qkv_g[0:NUM_HEADS].reshape(NB, SEQ, HEAD_DIM)                  # already scaled
    k = qkv_g[NUM_HEADS:2 * NUM_HEADS].reshape(NB, SEQ, HEAD_DIM)
    v = qkv_g[2 * NUM_HEADS:3 * NUM_HEADS].reshape(NB, SEQ, HEAD_DIM)

    # ---- batched attention over the leading (NH*B) axis ----
    s = jnp.einsum("bqd,bkd->bqk", q, k,
                   preferred_element_type=jnp.float32)                 # (NB, S, S)
    s = s - jnp.max(s, axis=-1, keepdims=True)
    p = jnp.exp(s)
    p = p * pl.reciprocal(jnp.sum(p, axis=-1, keepdims=True), approx=True)
    ctx = jnp.einsum("bqk,bkd->bqd", p, v,
                     preferred_element_type=jnp.float32)                # (NB, S, HD)

    # ---- ViTSelfOutput dense folded per head (ctx never hits VMEM scratch) ----
    ctx_h = ctx.reshape(NUM_HEADS, TOKENS, HEAD_DIM)                    # pure reshape back
    attn_parts = jnp.einsum("ntd,ndh->nth", ctx_h, woh_ref[...],
                            preferred_element_type=jnp.float32)         # (NH, T, H)
    attn_out = jnp.sum(attn_parts, axis=0) + bo_ref[...]                # (T, H)

    # ---- first residual (attention dropout is identity at eval) ----
    x2 = attn_out + x

    # ---- layernorm_after ----
    h2 = _layernorm(x2, ln2g_ref[...], ln2b_ref[...])

    # ---- ViTIntermediate: dense + exact GELU ----
    ff = jnp.dot(h2, wi_ref[...], preferred_element_type=jnp.float32) + bi_ref[...]
    ff = 0.5 * ff * (1.0 + lax.erf(ff * INV_SQRT2))

    # ---- ViTOutput: dense + second residual (dropout identity at eval) ----
    out = jnp.dot(ff, wout_ref[...],
                  preferred_element_type=jnp.float32) + bout_ref[...] + x2

    out_ref[...] = out.astype(out_ref.dtype)


_FUSED_ORDER = (
    "ln1_g", "ln1_b",
    "wqkv", "bqkv",
    "wo_h", "bo",
    "ln2_g", "ln2_b",
    "wi", "bi",
    "wout", "bout",
)


def fuse_params(p):
    """One-time weight prep: fuse Q|K|V, fold the attention scale into Q,
    and pre-reshape wo to per-head (NH, HEAD_DIM, H) form."""
    fp = {k: p[k] for k in ("ln1_g", "ln1_b", "bo", "ln2_g", "ln2_b",
                            "wi", "bi", "wout", "bout")}
    fp["wqkv"] = jnp.concatenate([p["wq"] * SCALE, p["wk"], p["wv"]], axis=1)   # (H, 3H)
    fp["bqkv"] = jnp.concatenate([p["bq"] * SCALE, p["bk"], p["bv"]], axis=1)   # (1, 3H)
    fp["wo_h"] = p["wo"].reshape(NUM_HEADS, HEAD_DIM, HIDDEN)                   # (NH, HD, H)
    return fp


def _cost_estimate():
    T, H, I = TOKENS, HIDDEN, INTERMEDIATE
    flops = (2 * T * H * 3 * H                         # fused qkv projection
             + 2 * NB * SEQ * SEQ * HEAD_DIM           # scores
             + 2 * NB * SEQ * SEQ * HEAD_DIM           # p @ v
             + 2 * NUM_HEADS * T * HEAD_DIM * H        # per-head output projection
             + 2 * T * H * I + 2 * T * I * H)          # MLP
    transcendentals = NB * SEQ * SEQ + T * I + 2 * T + NB * SEQ   # exp, erf, rsqrt, recip
    param_bytes = 4 * (2 * H + 3 * H * H + 3 * H + H * H + H + 2 * H
                       + H * I + I + I * H + H)
    bytes_accessed = 4 * (2 * T * H) + param_bytes
    return pl.CostEstimate(flops=flops, transcendentals=transcendentals,
                           bytes_accessed=bytes_accessed)


def vit_layer(x, fused_params):
    """x: (B, S, H) float32.  fused_params: dict from fuse_params()."""
    B, S, H = x.shape
    x2d = x.reshape(B * S, H)   # fold batch into rows -> single no-grid invocation
    ordered = [fused_params[k] for k in _FUSED_ORDER]

    vmem_spec = pl.BlockSpec(memory_space=pltpu.MemorySpace.VMEM)
    out2d = pl.pallas_call(
        vit_layer_kernel,
        out_shape=jax.ShapeDtypeStruct((B * S, H), x.dtype),
        in_specs=[vmem_spec] * (1 + len(ordered)),
        out_specs=vmem_spec,
        cost_estimate=_cost_estimate(),
    )(x2d, *ordered)
    return out2d.reshape(B, S, H)


def vit_layer_ref(x, p):
    """Pure-JAX reference mirroring the PyTorch ViTLayer forward (unfused params)."""
    def ln(v, g, b):
        mu = jnp.mean(v, axis=-1, keepdims=True)
        var = jnp.mean((v - mu) ** 2, axis=-1, keepdims=True)
        return (v - mu) / jnp.sqrt(var + LN_EPS) * g + b

    B, S, H = x.shape
    h1 = ln(x, p["ln1_g"], p["ln1_b"])
    q = h1 @ p["wq"] + p["bq"]
    k = h1 @ p["wk"] + p["bk"]
    v = h1 @ p["wv"] + p["bv"]
    q = q.reshape(B, S, NUM_HEADS, HEAD_DIM).transpose(0, 2, 1, 3)
    k = k.reshape(B, S, NUM_HEADS, HEAD_DIM).transpose(0, 2, 1, 3)
    v = v.reshape(B, S, NUM_HEADS, HEAD_DIM).transpose(0, 2, 1, 3)
    s = jnp.einsum("bhqd,bhkd->bhqk", q, k) * SCALE
    pattn = jax.nn.softmax(s, axis=-1)
    ctx = jnp.einsum("bhqk,bhkd->bhqd", pattn, v)
    ctx = ctx.transpose(0, 2, 1, 3).reshape(B, S, H)
    attn_out = ctx @ p["wo"] + p["bo"]
    x2 = attn_out + x
    h2 = ln(x2, p["ln2_g"], p["ln2_b"])
    ff = h2 @ p["wi"] + p["bi"]
    ff = 0.5 * ff * (1.0 + lax.erf(ff * INV_SQRT2))
    return ff @ p["wout"] + p["bout"] + x2


def make_params(key):
    ks = jax.random.split(key, 8)
    scale = 0.02
    p = {
        "ln1_g": jnp.ones((1, HIDDEN), jnp.float32),
        "ln1_b": jnp.zeros((1, HIDDEN), jnp.float32),
        "wq": scale * jax.random.normal(ks[0], (HIDDEN, HIDDEN), jnp.float32),
        "bq": jnp.zeros((1, HIDDEN), jnp.float32),
        "wk": scale * jax.random.normal(ks[1], (HIDDEN, HIDDEN), jnp.float32),
        "bk": jnp.zeros((1, HIDDEN), jnp.float32),
        "wv": scale * jax.random.normal(ks[2], (HIDDEN, HIDDEN), jnp.float32),
        "bv": jnp.zeros((1, HIDDEN), jnp.float32),
        "wo": scale * jax.random.normal(ks[3], (HIDDEN, HIDDEN), jnp.float32),
        "bo": scale * jax.random.normal(ks[4], (1, HIDDEN), jnp.float32),
        "ln2_g": jnp.ones((1, HIDDEN), jnp.float32),
        "ln2_b": jnp.zeros((1, HIDDEN), jnp.float32),
        "wi": scale * jax.random.normal(ks[5], (HIDDEN, INTERMEDIATE), jnp.float32),
        "bi": scale * jax.random.normal(ks[6], (1, INTERMEDIATE), jnp.float32),
        "wout": scale * jax.random.normal(ks[7], (INTERMEDIATE, HIDDEN), jnp.float32),
        "bout": jnp.zeros((1, HIDDEN), jnp.float32),
    }
    return p


if __name__ == "__main__":
    key = jax.random.PRNGKey(0)
    kx, kp = jax.random.split(key)
    x = jax.random.normal(kx, (BATCH, SEQ, HIDDEN), jnp.float32)
    params = make_params(kp)
    fused = fuse_params(params)

    out = vit_layer(x, fused)
    out = jax.block_until_ready(out)

    ref = vit_layer_ref(x, params)
    np.testing.assert_allclose(np.asarray(out), np.asarray(ref), atol=1e-4, rtol=1e-4)

    print("KERNEL_OK")
</pallas_src>

<mosaic_0001>
module attributes {stable_mosaic.version = 11 : i64} {
  func.func @vit_layer_kernel(%arg0: memref<16x32xf32, #tpu.memory_space<vmem>>, %arg1: memref<1x32xf32, #tpu.memory_space<vmem>>, %arg2: memref<1x32xf32, #tpu.memory_space<vmem>>, %arg3: memref<32x96xf32, #tpu.memory_space<vmem>>, %arg4: memref<1x96xf32, #tpu.memory_space<vmem>>, %arg5: memref<4x8x32xf32, #tpu.memory_space<vmem>>, %arg6: memref<1x32xf32, #tpu.memory_space<vmem>>, %arg7: memref<1x32xf32, #tpu.memory_space<vmem>>, %arg8: memref<1x32xf32, #tpu.memory_space<vmem>>, %arg9: memref<32x128xf32, #tpu.memory_space<vmem>>, %arg10: memref<1x128xf32, #tpu.memory_space<vmem>>, %arg11: memref<128x32xf32, #tpu.memory_space<vmem>>, %arg12: memref<1x32xf32, #tpu.memory_space<vmem>>, %arg13: memref<16x32xf32, #tpu.memory_space<vmem>>) attributes {dimension_semantics = [], scalar_prefetch = 0 : i64, scratch_operands = 0 : i64, tpu.core_type = #tpu.core_type<tc>} {
    %c0 = arith.constant 0 : index
    %c0_0 = arith.constant 0 : index
    %0 = vector.load %arg0[%c0, %c0_0] : memref<16x32xf32, #tpu.memory_space<vmem>>, vector<16x32xf32>
    %c0_1 = arith.constant 0 : index
    %c0_2 = arith.constant 0 : index
    %1 = vector.load %arg1[%c0_1, %c0_2] : memref<1x32xf32, #tpu.memory_space<vmem>>, vector<1x32xf32>
    %c0_3 = arith.constant 0 : index
    %c0_4 = arith.constant 0 : index
    %2 = vector.load %arg2[%c0_3, %c0_4] : memref<1x32xf32, #tpu.memory_space<vmem>>, vector<1x32xf32>
    %cst = arith.constant dense<0.000000e+00> : vector<16xf32>
    %3 = vector.multi_reduction <add>, %0, %cst [1] : vector<16x32xf32> to vector<16xf32>
    %4 = vector.shape_cast %3 : vector<16xf32> to vector<16x1xf32>
    %cst_5 = arith.constant 3.200000e+01 : f32
    %5 = vector.broadcast %cst_5 : f32 to vector<16x1xf32>
    %6 = arith.divf %4, %5 : vector<16x1xf32>
    %7 = vector.broadcast %6 : vector<16x1xf32> to vector<16x32xf32>
    %8 = arith.subf %0, %7 : vector<16x32xf32>
    %9 = arith.mulf %8, %8 : vector<16x32xf32>
    %cst_6 = arith.constant dense<0.000000e+00> : vector<16xf32>
    %10 = vector.multi_reduction <add>, %9, %cst_6 [1] : vector<16x32xf32> to vector<16xf32>
    %11 = vector.shape_cast %10 : vector<16xf32> to vector<16x1xf32>
    %cst_7 = arith.constant 3.200000e+01 : f32
    %12 = vector.broadcast %cst_7 : f32 to vector<16x1xf32>
    %13 = arith.divf %11, %12 : vector<16x1xf32>
    %14 = vector.broadcast %6 : vector<16x1xf32> to vector<16x32xf32>
    %15 = arith.subf %0, %14 : vector<16x32xf32>
    %cst_8 = arith.constant 9.99999996E-13 : f32
    %16 = vector.broadcast %cst_8 : f32 to vector<16x1xf32>
    %17 = arith.addf %13, %16 : vector<16x1xf32>
    %18 = math.rsqrt %17 : vector<16x1xf32>
    %19 = vector.broadcast %18 : vector<16x1xf32> to vector<16x32xf32>
    %20 = arith.mulf %15, %19 : vector<16x32xf32>
    %21 = vector.broadcast %1 : vector<1x32xf32> to vector<16x32xf32>
    %22 = arith.mulf %20, %21 : vector<16x32xf32>
    %23 = vector.broadcast %2 : vector<1x32xf32> to vector<16x32xf32>
    %24 = arith.addf %22, %23 : vector<16x32xf32>
    %c0_9 = arith.constant 0 : index
    %c0_10 = arith.constant 0 : index
    %25 = vector.load %arg3[%c0_9, %c0_10] : memref<32x96xf32, #tpu.memory_space<vmem>>, vector<32x96xf32>
    %cst_11 = arith.constant dense<0.000000e+00> : vector<16x96xf32>
    %26 = tpu.matmul %24, %25, %cst_11 {dimension_numbers = #tpu.dot_dimension_numbers<[1], [0], [0], [1], [0, 0, 1, 1], [], []>} : vector<16x32xf32>, vector<32x96xf32>, vector<16x96xf32> -> vector<16x96xf32>
    %c0_12 = arith.constant 0 : index
    %c0_13 = arith.constant 0 : index
    %27 = vector.load %arg4[%c0_12, %c0_13] : memref<1x96xf32, #tpu.memory_space<vmem>>, vector<1x96xf32>
    %28 = vector.broadcast %27 : vector<1x96xf32> to vector<16x96xf32>
    %29 = arith.addf %26, %28 : vector<16x96xf32>
    %30 = vector.shape_cast %29 : vector<16x96xf32> to vector<16x12x8xf32>
    %31 = tpu.transpose %30, [1, 0, 2] : vector<16x12x8xf32> -> vector<12x16x8xf32>
    %32 = vector.extract_strided_slice %31 {offsets = [0, 0, 0], sizes = [4, 16, 8], strides = [1, 1, 1]} : vector<12x16x8xf32> to vector<4x16x8xf32>
    %33 = vector.shape_cast %32 : vector<4x16x8xf32> to vector<8x8x8xf32>
    %34 = vector.extract_strided_slice %31 {offsets = [4, 0, 0], sizes = [4, 16, 8], strides = [1, 1, 1]} : vector<12x16x8xf32> to vector<4x16x8xf32>
    %35 = vector.shape_cast %34 : vector<4x16x8xf32> to vector<8x8x8xf32>
    %36 = vector.extract_strided_slice %31 {offsets = [8, 0, 0], sizes = [4, 16, 8], strides = [1, 1, 1]} : vector<12x16x8xf32> to vector<4x16x8xf32>
    %37 = vector.shape_cast %36 : vector<4x16x8xf32> to vector<8x8x8xf32>
    "tpu.trace_start"() <{level = 10 : i32, message = "bqd,bkd->bqk"}> : () -> ()
    %cst_14 = arith.constant dense<0.000000e+00> : vector<8x8x8xf32>
    %38 = tpu.matmul %33, %35, %cst_14 {dimension_numbers = #tpu.dot_dimension_numbers<[2], [2], [1], [1], [0, 0, 0, 1, 1, 1], [0], [0]>} : vector<8x8x8xf32>, vector<8x8x8xf32>, vector<8x8x8xf32> -> vector<8x8x8xf32>
    "tpu.trace_stop"() : () -> ()
    %cst_15 = arith.constant dense<0xFF800000> : vector<8x8xf32>
    %39 = vector.multi_reduction <maximumf>, %38, %cst_15 [2] : vector<8x8x8xf32> to vector<8x8xf32>
    %40 = vector.shape_cast %39 : vector<8x8xf32> to vector<8x8x1xf32>
    %41 = vector.broadcast %40 : vector<8x8x1xf32> to vector<8x8x8xf32>
    %42 = arith.subf %38, %41 : vector<8x8x8xf32>
    %43 = math.exp %42 : vector<8x8x8xf32>
    %cst_16 = arith.constant dense<0.000000e+00> : vector<8x8xf32>
    %44 = vector.multi_reduction <add>, %43, %cst_16 [2] : vector<8x8x8xf32> to vector<8x8xf32>
    %45 = vector.shape_cast %44 : vector<8x8xf32> to vector<8x8x1xf32>
    %46 = tpu.reciprocal %45 {approx = true} : vector<8x8x1xf32> -> vector<8x8x1xf32>
    %47 = vector.broadcast %46 : vector<8x8x1xf32> to vector<8x8x8xf32>
    %48 = arith.mulf %43, %47 : vector<8x8x8xf32>
    "tpu.trace_start"() <{level = 10 : i32, message = "bqk,bkd->bqd"}> : () -> ()
    %cst_17 = arith.constant dense<0.000000e+00> : vector<8x8x8xf32>
    %49 = tpu.matmul %48, %37, %cst_17 {dimension_numbers = #tpu.dot_dimension_numbers<[2], [1], [1], [2], [0, 0, 0, 1, 1, 2], [0], [0]>} : vector<8x8x8xf32>, vector<8x8x8xf32>, vector<8x8x8xf32> -> vector<8x8x8xf32>
    "tpu.trace_stop"() : () -> ()
    %50 = vector.shape_cast %49 : vector<8x8x8xf32> to vector<4x16x8xf32>
    %c0_18 = arith.constant 0 : index
    %c0_19 = arith.constant 0 : index
    %c0_20 = arith.constant 0 : index
    %51 = vector.load %arg5[%c0_18, %c0_19, %c0_20] : memref<4x8x32xf32, #tpu.memory_space<vmem>>, vector<4x8x32xf32>
    "tpu.trace_start"() <{level = 10 : i32, message = "ntd,ndh->nth"}> : () -> ()
    %cst_21 = arith.constant dense<0.000000e+00> : vector<4x16x32xf32>
    %52 = tpu.matmul %50, %51, %cst_21 {dimension_numbers = #tpu.dot_dimension_numbers<[2], [1], [1], [2], [0, 0, 0, 1, 1, 2], [0], [0]>} : vector<4x16x8xf32>, vector<4x8x32xf32>, vector<4x16x32xf32> -> vector<4x16x32xf32>
    "tpu.trace_stop"() : () -> ()
    %cst_22 = arith.constant dense<0.000000e+00> : vector<16x32xf32>
    %53 = vector.multi_reduction <add>, %52, %cst_22 [0] : vector<4x16x32xf32> to vector<16x32xf32>
    %c0_23 = arith.constant 0 : index
    %c0_24 = arith.constant 0 : index
    %54 = vector.load %arg6[%c0_23, %c0_24] : memref<1x32xf32, #tpu.memory_space<vmem>>, vector<1x32xf32>
    %55 = vector.broadcast %54 : vector<1x32xf32> to vector<16x32xf32>
    %56 = arith.addf %53, %55 : vector<16x32xf32>
    %57 = arith.addf %56, %0 : vector<16x32xf32>
    %c0_25 = arith.constant 0 : index
    %c0_26 = arith.constant 0 : index
    %58 = vector.load %arg7[%c0_25, %c0_26] : memref<1x32xf32, #tpu.memory_space<vmem>>, vector<1x32xf32>
    %c0_27 = arith.constant 0 : index
    %c0_28 = arith.constant 0 : index
    %59 = vector.load %arg8[%c0_27, %c0_28] : memref<1x32xf32, #tpu.memory_space<vmem>>, vector<1x32xf32>
    %cst_29 = arith.constant dense<0.000000e+00> : vector<16xf32>
    %60 = vector.multi_reduction <add>, %57, %cst_29 [1] : vector<16x32xf32> to vector<16xf32>
    %61 = vector.shape_cast %60 : vector<16xf32> to vector<16x1xf32>
    %cst_30 = arith.constant 3.200000e+01 : f32
    %62 = vector.broadcast %cst_30 : f32 to vector<16x1xf32>
    %63 = arith.divf %61, %62 : vector<16x1xf32>
    %64 = vector.broadcast %63 : vector<16x1xf32> to vector<16x32xf32>
    %65 = arith.subf %57, %64 : vector<16x32xf32>
    %66 = arith.mulf %65, %65 : vector<16x32xf32>
    %cst_31 = arith.constant dense<0.000000e+00> : vector<16xf32>
    %67 = vector.multi_reduction <add>, %66, %cst_31 [1] : vector<16x32xf32> to vector<16xf32>
    %68 = vector.shape_cast %67 : vector<16xf32> to vector<16x1xf32>
    %cst_32 = arith.constant 3.200000e+01 : f32
    %69 = vector.broadcast %cst_32 : f32 to vector<16x1xf32>
    %70 = arith.divf %68, %69 : vector<16x1xf32>
    %71 = vector.broadcast %63 : vector<16x1xf32> to vector<16x32xf32>
    %72 = arith.subf %57, %71 : vector<16x32xf32>
    %cst_33 = arith.constant 9.99999996E-13 : f32
    %73 = vector.broadcast %cst_33 : f32 to vector<16x1xf32>
    %74 = arith.addf %70, %73 : vector<16x1xf32>
    %75 = math.rsqrt %74 : vector<16x1xf32>
    %76 = vector.broadcast %75 : vector<16x1xf32> to vector<16x32xf32>
    %77 = arith.mulf %72, %76 : vector<16x32xf32>
    %78 = vector.broadcast %58 : vector<1x32xf32> to vector<16x32xf32>
    %79 = arith.mulf %77, %78 : vector<16x32xf32>
    %80 = vector.broadcast %59 : vector<1x32xf32> to vector<16x32xf32>
    %81 = arith.addf %79, %80 : vector<16x32xf32>
    %c0_34 = arith.constant 0 : index
    %c0_35 = arith.constant 0 : index
    %82 = vector.load %arg9[%c0_34, %c0_35] : memref<32x128xf32, #tpu.memory_space<vmem>>, vector<32x128xf32>
    %cst_36 = arith.constant dense<0.000000e+00> : vector<16x128xf32>
    %83 = tpu.matmul %81, %82, %cst_36 {dimension_numbers = #tpu.dot_dimension_numbers<[1], [0], [0], [1], [0, 0, 1, 1], [], []>} : vector<16x32xf32>, vector<32x128xf32>, vector<16x128xf32> -> vector<16x128xf32>
    %c0_37 = arith.constant 0 : index
    %c0_38 = arith.constant 0 : index
    %84 = vector.load %arg10[%c0_37, %c0_38] : memref<1x128xf32, #tpu.memory_space<vmem>>, vector<1x128xf32>
    %85 = vector.broadcast %84 : vector<1x128xf32> to vector<16x128xf32>
    %86 = arith.addf %83, %85 : vector<16x128xf32>
    %cst_39 = arith.constant 5.000000e-01 : f32
    %87 = vector.broadcast %cst_39 : f32 to vector<16x128xf32>
    %88 = arith.mulf %87, %86 : vector<16x128xf32>
    %cst_40 = arith.constant 0.707106769 : f32
    %89 = vector.broadcast %cst_40 : f32 to vector<16x128xf32>
    %90 = arith.mulf %86, %89 : vector<16x128xf32>
    %91 = math.erf %90 : vector<16x128xf32>
    %cst_41 = arith.constant 1.000000e+00 : f32
    %92 = vector.broadcast %cst_41 : f32 to vector<16x128xf32>
    %93 = arith.addf %92, %91 : vector<16x128xf32>
    %94 = arith.mulf %88, %93 : vector<16x128xf32>
    %c0_42 = arith.constant 0 : index
    %c0_43 = arith.constant 0 : index
    %95 = vector.load %arg11[%c0_42, %c0_43] : memref<128x32xf32, #tpu.memory_space<vmem>>, vector<128x32xf32>
    %cst_44 = arith.constant dense<0.000000e+00> : vector<16x32xf32>
    %96 = tpu.matmul %94, %95, %cst_44 {dimension_numbers = #tpu.dot_dimension_numbers<[1], [0], [0], [1], [0, 0, 1, 1], [], []>} : vector<16x128xf32>, vector<128x32xf32>, vector<16x32xf32> -> vector<16x32xf32>
    %c0_45 = arith.constant 0 : index
    %c0_46 = arith.constant 0 : index
    %97 = vector.load %arg12[%c0_45, %c0_46] : memref<1x32xf32, #tpu.memory_space<vmem>>, vector<1x32xf32>
    %98 = vector.broadcast %97 : vector<1x32xf32> to vector<16x32xf32>
    %99 = arith.addf %96, %98 : vector<16x32xf32>
    %100 = arith.addf %99, %57 : vector<16x32xf32>
    %c0_47 = arith.constant 0 : index
    %c0_48 = arith.constant 0 : index
    %101 = vector.load %arg13[%c0_47, %c0_48] : memref<16x32xf32, #tpu.memory_space<vmem>>, vector<16x32xf32>
    tpu.vector_store %arg13[%c0_47, %c0_48], %100 {strides = array<i32>} : memref<16x32xf32, #tpu.memory_space<vmem>>, vector<16x32xf32>,
    return
  }
}

</mosaic_0001>

<bundles_post_ra>
// kernel: tpu_custom_call.1
= control target key start
LH: loop header
LB: loop body
LE: loop exit
PB: predicated region body
PF: predicated region fallthrough
CT: control target
= control target key end

     0   :  { %vm49_vm0 = vcmask 261120   ;;  %s2653_s0 = inlined_call_operand.vmem [shape: f32[16,32], index: 0, kind: input, shape index: {}]   ;;  %s2654_s1 = inlined_call_operand.vmem [shape: f32[1,32], index: 1, kind: input, shape index: {}]   ;;  %s2655_s2 = inlined_call_operand.vmem [shape: f32[1,32], index: 2, kind: input, shape index: {}]   ;;  %s2656_s3 = inlined_call_operand.vmem [shape: f32[32,96], index: 3, kind: input, shape index: {}]   ;;  %s2657_s4 = inlined_call_operand.vmem [shape: f32[1,96], index: 4, kind: input, shape index: {}]   ;;  %s2658_s5 = inlined_call_operand.vmem [shape: f32[4,8,32], index: 5, kind: input, shape index: {}]   ;;  %s2659_s6 = inlined_call_operand.vmem [shape: f32[1,32], index: 6, kind: input, shape index: {}]   ;;  %s2660_s7 = inlined_call_operand.vmem [shape: f32[1,32], index: 7, kind: input, shape index: {}]   ;;  %s2661_s8 = inlined_call_operand.vmem [shape: f32[1,32], index: 8, kind: input, shape index: {}]   ;;  %s2662_s9 = inlined_call_operand.vmem [shape: f32[32,128], index: 9, kind: input, shape index: {}]   ;;  %s2663_s10 = inlined_call_operand.vmem [shape: f32[1,128], index: 10, kind: input, shape index: {}]   ;;  %s2664_s11 = inlined_call_operand.vmem [shape: f32[128,32], index: 11, kind: input, shape index: {}]   ;;  %s2665_s12 = inlined_call_operand.vmem [shape: f32[1,32], index: 12, kind: input, shape index: {}]   ;;  %s2666_s13 = inlined_call_operand.hbm [shape: f32[16,32], index: 13, kind: output, shape index: {}]  }
   0x1   :  { %v46_v0 = vld [vmem:[%s2653_s0 + $0x8] sm:$0xff] }
   0x2   :  { %v53_v1 = vsel %vm49_vm0, %v46_v0, 0.0 }
   0x3   :  { %54 = vadd.xlane.f32.xlu0 %v53_v1 }
   0x4   :  { %18 = vsyncpa [#allocation3], 0  ;;  %v45_v2 = vld [vmem:[%s2653_s0] sm:$0xff]  ;;  %v1915_v4 = vmov 32.0   ;;  %v114_v21 = vld [vmem:[%s2656_s3 + $0x18] sm:$0xff]  ;;  %s1917_s24 = smov 104  }
   0x5   :  { %v50_v3 = vsel %vm49_vm0, %v45_v2, 0.0  ;;  %1841 = vrcp.f32 %v1915_v4  ;;  %1792 = vmatpush.msra.mxu2 %v114_v21  ;;  %137 = vmatpush.msra.mxu1 %v114_v21  ;;  %v113_v22 = vld [vmem:[%s2656_s3 + $0x10] sm:$0xff]  ;;  %v112_v23 = vld [vmem:[%s2656_s3 + $0x8] sm:$0xff]  ;;  %v111_v24 = vld [vmem:[%s2656_s3] sm:$0xff]  ;;  %s1918_s25 = smov 120   ;;  %s1919_s26 = smov 112  }
   0x6   :  { %v1833_v39 = vld [vmem:[%s2654_s1] ss:$0 sm:$0xff]  ;;  %s1920_s27 = smov 80   ;;  %s1922_s28 = smov 96   ;;  %v1924_v62 = vmov 1983009808  }
   0x7   :  { %1793 = vmatpush.msra.mxu2 %v113_v22  ;;  %138 = vmatpush.msra.mxu1 %v113_v22  ;;  %v1834_v43 = vld [vmem:[%s2655_s2] ss:$0 sm:$0xff]  ;;  %s1916_s2 = smov 88   ;;  %s1923_s29 = smov 64   ;;  %v222_v63 = vunpack.c.l.s4 %v1924_v62  ;;  %vm217_vm8 = vcmask 1047556   ;;  %vm885_vm9 = vcmask 64512  }
   0x8   :  { %v1835_v53 = vld [vmem:[%s2657_s4] ss:$0 sm:$0xff]  ;;  %s1921_s4 = smov 72   ;;  %s1926_s30 = smov 40  }
   0x9   :  { %1794 = vmatpush.msra.mxu2 %v112_v23  ;;  %139 = vmatpush.msra.mxu1 %v112_v23  ;;  %s1927_s14 = smov 56   ;;  %s1928_s15 = smov 48  }
   0xa   :  { %s1929_s20 = smov [#allocation2]   ;;  %s1742_s1 = sshll.u32 %s2666_s13, 4  ;;  %s1743_s1 = int_to_ptr.hbm [resolvable:$true] %s1742_s1 }
   0xb   :  { %51 = vadd.xlane.f32.xlu0 %v50_v3  ;;  %v1842_v5 = vpop.eup %1841  ;;  %1795 = vmatpush.msra.mxu2 %v111_v24  ;;  %s1740_s21 = sshll.u32 %s1929_s20, 4  ;;  %s1931_s23 = smov 8   ;;  %s1741_s21 = int_to_ptr.vmem [resolvable:$true] %s1740_s21 }
   0xc   :  { %v57_v6 = vmul.f32 32.0, %v1842_v5  ;;  %vm61_vm1 = vweird.f32 %v1842_v5  ;;  %140 = vmatpush.msra.mxu1 %v111_v24 }
   0xe   :  { %v58_v7 = vsub.f32 1.0, %v57_v6 }
  0x10   :  { %v59_v8 = vmul.f32 %v1842_v5, %v58_v7 }
  0x12   :  { %v60_v9 = vadd.f32 %v1842_v5, %v59_v8 }
  0x14   :  { %v2010_v10 = vsel %vm61_vm1, %v1842_v5, %v60_v9 }
  0x76   :  { %v55_v11 = vpop.xlane.xlu0 %54 }
  0x77   :  { %v64_v12 = vmul.f32 %v2010_v10, %v55_v11 }
  0x79   :  { %v66_v13 = vsub.f32 %v46_v0, %v64_v12 }
  0x7b   :  { %v68_v14 = vmul.f32 %v66_v13, %v66_v13 }
  0x7d   :  { %v72_v15 = vsel %vm49_vm0, %v68_v14, 0.0 }
  0x7e   :  { %73 = vadd.xlane.f32.xlu1 %v72_v15  ;;  %v52_v16 = vpop.xlane.xlu0 %51  ;;  %v1925_v15 = vmov 1934713408  }
  0x7f   :  { %v63_v17 = vmul.f32 %v2010_v10, %v52_v16  ;;  %v270_v16 = vunpack.c.l.s4 %v1925_v15 }
  0x81   :  { %v65_v18 = vsub.f32 %v45_v2, %v63_v17  ;;  %v2056_v2 = vunpack.c.0.s8 %v222_v63  ;;  %v2067_v24 = vunpack.c.0.s8 %v270_v16 }
  0x83   :  { %v67_v19 = vmul.f32 %v65_v18, %v65_v18 }
  0x85   :  { %v69_v20 = vsel %vm49_vm0, %v67_v19, 0.0 }
  0x86   :  { %70 = vadd.xlane.f32.xlu1 %v69_v20 }
  0xf1   :  { %v74_v25 = vpop.xlane.xlu1 %73 }
  0xf2   :  { %v76_v26 = vmul.f32 %v74_v25, %v2010_v10 }
  0xf4   :  { %v78_v27 = vadd.f32 1e-12, %v76_v26 }
  0xf6   :  { %1843 = vrsqrt.f32 %v78_v27  ;;  %vm95_vm3 = vweird.f32 %v78_v27 }
  0xf9   :  { %v71_v28 = vpop.xlane.xlu1 %70 }
  0xfa   :  { %v75_v29 = vmul.f32 %v71_v28, %v2010_v10 }
  0xfc   :  { %v1844_v30 = vpop.eup %1843  ;;  %v77_v31 = vadd.f32 1e-12, %v75_v29 }
  0xfd   :  { %v90_v32 = vmul.f32 %v1844_v30, %v78_v27  ;;  %vm96_vm2 = vweird.f32 %v1844_v30 }
  0xfe   :  { %1845 = vrsqrt.f32 %v77_v31  ;;  %vm97_vm4 = vmor %vm95_vm3, %vm96_vm2  ;;  %vm85_vm6 = vweird.f32 %v77_v31 }
  0xff   :  { %v91_v33 = vmul.f32 %v1844_v30, %v90_v32 }
 0x101   :  { %v92_v34 = vmul.f32 0.5, %v91_v33 }
 0x103   :  { %v93_v35 = vsub.f32 1.5, %v92_v34 }
 0x104   :  { %v1846_v36 = vpop.eup %1845 }
 0x105   :  { %v94_v37 = vmul.f32 %v1844_v30, %v93_v35  ;;  %v80_v38 = vmul.f32 %v1846_v36, %v77_v31  ;;  %vm86_vm5 = vweird.f32 %v1846_v36 }
 0x106   :  { %vm87_vm7 = vmor %vm85_vm6, %vm86_vm5 }
 0x107   :  { %v98_v40 = vsel %vm97_vm4, %v1844_v30, %v94_v37  ;;  %v81_v41 = vmul.f32 %v1846_v36, %v80_v38 }
 0x108   :  { %v100_v42 = vmul.f32 %v98_v40, %v66_v13 }
 0x109   :  { %v82_v44 = vmul.f32 0.5, %v81_v41 }
 0x10a   :  { %v105_v45 = vmul.f32 %v1833_v39, %v100_v42 }
 0x10b   :  { %v83_v46 = vsub.f32 1.5, %v82_v44 }
 0x10c   :  { %v110_v47 = vadd.f32 %v1834_v43, %v105_v45 }
 0x10d   :  { %v84_v48 = vmul.f32 %v1846_v36, %v83_v46 }
 0x10e   :  { %1755 = vmatmul.msk.f32.vlgmr.msra.gmra.mxu2 %vm49_vm0, %v110_v47 }
 0x10f   :  { %v88_v49 = vsel %vm87_vm7, %v1846_v36, %v84_v48 }
 0x110   :  { %v99_v50 = vmul.f32 %v88_v49, %v65_v18 }
 0x112   :  { %v104_v51 = vmul.f32 %v1833_v39, %v99_v50 }
 0x114   :  { %v109_v52 = vadd.f32 %v1834_v43, %v104_v51 }
 0x116   :  { %1754 = vmatmul.msk.f32.vlgmr.msra.gmra.mxu1 %vm49_vm0, %v109_v52 }
 0x191   :  { %v145_v56 = vpop.f32.mrf.mxu2 }
 0x192   :  { %v146_v57 = vadd.f32 %v1835_v53, %v145_v56 }
 0x193   :  { %v142_v54 = vpop.f32.mrf.mxu1 }
 0x194   :  { %v2041_v55 = vadd.f32 %v1835_v53, %v142_v54  ;;  %v387_v4 = vrot.slane %v146_v57, 4 }
 0x196   :  { %174 = vrot.lane.b32.xlu2 %v2041_v55, %s1916_s2  ;;  %162 = vrot.lane.b32.xlu0 %v2041_v55, %s1917_s24  ;;  %v2050_v58 = vpack.i.bf16 %v146_v57, %v2041_v55  ;;  %v219_v29 = vrot.slane %v2041_v55, 4 }
 0x197   :  { %150 = vrot.lane.b32.xlu1 %v2041_v55, %s1918_s25 }
 0x19e   :  { %152 = vrot.lane.b32.xlu2 %v146_v57, %s1918_s25  ;;  %156 = vrot.lane.b32.xlu0 %v2041_v55, %s1919_s26 }
 0x19f   :  { %182 = vrot.lane.b32.xlu1 %v146_v57, %s1920_s27 }
 0x1a6   :  { %164 = vrot.lane.b32.xlu2 %v146_v57, %s1917_s24  ;;  %176 = vrot.lane.b32.xlu0 %v146_v57, %s1916_s2 }
 0x1a7   :  { %186 = vrot.lane.b32.xlu1 %v2041_v55, %s1921_s4 }
 0x1ae   :  { %158 = vrot.lane.b32.xlu2 %v146_v57, %s1919_s26  ;;  %180 = vrot.lane.b32.xlu0 %v2041_v55, %s1920_s27 }
 0x1b6   :  { %170 = vrot.lane.b32.xlu2 %v146_v57, %s1922_s28  ;;  %1814 = vrot.lane.b32.xlu0 %v2050_v58, %s1923_s29 }
 0x1be   :  { %188 = vrot.lane.b32.xlu2 %v146_v57, %s1921_s4 }
 0x1c6   :  { %168 = vrot.lane.b32.xlu2 %v2041_v55, %s1922_s28 }
 0x1f0   :  { %v2054_v59 = vpop.permute.xlu2 %174 }
 0x1f1   :  { %v255_v51 = vrot.slane %v2054_v59, 4 }
 0x1f8   :  { %v153_v60 = vpop.permute.xlu2 %152 }
 0x1f9   :  { %v399_v1 = vrot.slane %v153_v60, 4 }
 0x200   :  { %v165_v61 = vpop.permute.xlu2 %164 }
 0x201   :  { %v397_v0 = vrot.slane %v165_v61, 4  ;;  %v400_v3 = vsel %vm217_vm8, %v165_v61, %v399_v1 }
 0x202   :  { %v408_v12 = vperm.slane %v400_v3, %v2056_v2 }
 0x203   :  { %v398_v5 = vsel %vm217_vm8, %v397_v0, %v153_v60 }
 0x204   :  { %v404_v14 = vperm.slane %v398_v5, %v2056_v2  ;;  %v445_v21 = vrot.slane %v408_v12, 4 }
 0x206   :  { %v433_v23 = vrot.slane %v404_v14, 4 }
 0x208   :  { %v159_v6 = vpop.permute.xlu2 %158  ;;  %v163_v7 = vpop.permute.xlu0 %162 }
 0x209   :  { %v385_v8 = vrot.slane %v159_v6, 4  ;;  %v388_v9 = vsel %vm217_vm8, %v159_v6, %v387_v4  ;;  %v151_v11 = vpop.permute.xlu1 %150  ;;  %v229_v20 = vrot.slane %v163_v7, 4 }
 0x20a   :  { %v231_v13 = vrot.slane %v151_v11, 4  ;;  %v396_v18 = vperm.slane %v388_v9, %v2056_v2 }
 0x20b   :  { %v386_v17 = vsel %vm217_vm8, %v385_v8, %v146_v57  ;;  %v230_v31 = vsel %vm217_vm8, %v229_v20, %v151_v11 }
 0x20c   :  { %v392_v19 = vperm.slane %v386_v17, %v2056_v2  ;;  %v232_v22 = vsel %vm217_vm8, %v163_v7, %v231_v13  ;;  %v446_v25 = vsel %vm217_vm8, %v445_v21, %v396_v18  ;;  %v447_v26 = vrot.slane %v396_v18, 4 }
 0x20d   :  { %v240_v32 = vperm.slane %v232_v22, %v2056_v2  ;;  %v2076_v39 = vperm.slane %v446_v25, %v2067_v24  ;;  %v236_v42 = vperm.slane %v230_v31, %v2056_v2 }
 0x20e   :  { %v434_v30 = vsel %vm217_vm8, %v433_v23, %v392_v19  ;;  %v435_v35 = vrot.slane %v392_v19, 4  ;;  %v448_v41 = vsel %vm217_vm8, %v408_v12, %v447_v26 }
 0x20f   :  { %v2085_v45 = vperm.slane %v434_v30, %v2067_v24  ;;  %v277_v49 = vrot.slane %v240_v32, 4  ;;  %v2092_v52 = vperm.slane %v448_v41, %v2067_v24  ;;  %v265_v56 = vrot.slane %v236_v42, 4 }
 0x210   :  { %v171_v27 = vpop.permute.xlu2 %170  ;;  %v157_v28 = vpop.permute.xlu0 %156  ;;  %v436_v48 = vsel %vm217_vm8, %v404_v14, %v435_v35 }
 0x211   :  { %v411_v33 = vrot.slane %v171_v27, 4  ;;  %v183_v34 = vpop.permute.xlu1 %182  ;;  %v216_v36 = vrot.slane %v157_v28, 4  ;;  %v220_v37 = vsel %vm217_vm8, %v157_v28, %v219_v29  ;;  %v444_v63 = vperm.slane %v436_v48, %v2067_v24 }
 0x212   :  { %v409_v38 = vrot.slane %v183_v34, 4  ;;  %v228_v40 = vperm.slane %v220_v37, %v2056_v2  ;;  %v483_v0 = vrot.slane %v2085_v45, 4  ;;  %v495_v18 = vrot.slane %v2092_v52, 4 }
 0x213   :  { %v218_v43 = vsel %vm217_vm8, %v216_v36, %v2041_v55  ;;  %v412_v44 = vsel %vm217_vm8, %v183_v34, %v411_v33  ;;  %v491_v55 = vrot.slane %v2076_v39, 4 }
 0x214   :  { %v224_v46 = vperm.slane %v218_v43, %v2056_v2  ;;  %v410_v47 = vsel %vm217_vm8, %v409_v38, %v171_v27  ;;  %v279_v50 = vrot.slane %v228_v40, 4  ;;  %v420_v54 = vperm.slane %v412_v44, %v2056_v2 }
 0x215   :  { %v278_v57 = vsel %vm217_vm8, %v277_v49, %v228_v40  ;;  %v416_v60 = vperm.slane %v410_v47, %v2056_v2  ;;  %v487_v27 = vrot.slane %v444_v63, 4 }
 0x216   :  { %v267_v53 = vrot.slane %v224_v46, 4  ;;  %v266_v5 = vsel %vm217_vm8, %v265_v56, %v224_v46  ;;  %v280_v7 = vsel %vm217_vm8, %v240_v32, %v279_v50  ;;  %v2104_v9 = vperm.slane %v278_v57, %v2067_v24 }
 0x217   :  { %v471_v11 = vrot.slane %v420_v54, 4  ;;  %v459_v14 = vrot.slane %v416_v60, 4  ;;  %v2114_v19 = vperm.slane %v266_v5, %v2067_v24  ;;  %v2120_v21 = vperm.slane %v280_v7, %v2067_v24 }
 0x218   :  { %v189_v61 = vpop.permute.xlu2 %188  ;;  %v177_v62 = vpop.permute.xlu0 %176  ;;  %v268_v6 = vsel %vm217_vm8, %v236_v42, %v267_v53  ;;  %v323_v30 = vrot.slane %v2104_v9, 4 }
 0x219   :  { %v421_v1 = vrot.slane %v189_v61, 4  ;;  %v423_v3 = vrot.slane %v177_v62, 4  ;;  %v187_v4 = vpop.permute.xlu1 %186  ;;  %v2117_v20 = vperm.slane %v268_v6, %v2067_v24  ;;  %v315_v35 = vrot.slane %v2114_v19, 4 }
 0x21a   :  { %v253_v8 = vrot.slane %v187_v4, 4  ;;  %v256_v28 = vsel %vm217_vm8, %v187_v4, %v255_v51  ;;  %v327_v41 = vrot.slane %v2120_v21, 4 }
 0x21b   :  { %v422_v12 = vsel %vm217_vm8, %v421_v1, %v177_v62  ;;  %v424_v13 = vsel %vm217_vm8, %v189_v61, %v423_v3  ;;  %v319_v40 = vrot.slane %v2117_v20, 4  ;;  %v264_v42 = vperm.slane %v256_v28, %v2056_v2 }
 0x21c   :  { %v428_v15 = vperm.slane %v422_v12, %v2056_v2  ;;  %v432_v16 = vperm.slane %v424_v13, %v2056_v2  ;;  %v254_v17 = vsel %vm217_vm8, %v253_v8, %v2054_v59 }
 0x21d   :  { %v260_v29 = vperm.slane %v254_v17, %v2056_v2  ;;  %v301_v62 = vrot.slane %v264_v42, 4 }
 0x21e   :  { %v457_v22 = vrot.slane %v428_v15, 4  ;;  %v460_v23 = vsel %vm217_vm8, %v428_v15, %v459_v14  ;;  %v469_v25 = vrot.slane %v432_v16, 4  ;;  %v472_v26 = vsel %vm217_vm8, %v432_v16, %v471_v11 }
 0x21f   :  { %v468_v59 = vperm.slane %v460_v23, %v2067_v24  ;;  %v480_v33 = vperm.slane %v472_v26, %v2067_v24  ;;  %v289_v49 = vrot.slane %v260_v29, 4 }
 0x220   :  { %v458_v31 = vsel %vm217_vm8, %v457_v22, %v416_v60  ;;  %v470_v32 = vsel %vm217_vm8, %v469_v25, %v420_v54  ;;  %v169_v34 = vpop.permute.xlu2 %168  ;;  %v181_v44 = vpop.permute.xlu0 %180 }
 0x221   :  { %v464_v36 = vperm.slane %v458_v31, %v2067_v24  ;;  %v476_v37 = vperm.slane %v470_v32, %v2067_v24  ;;  %v485_v38 = vrot.slane %v468_v59, 4  ;;  %v243_v43 = vrot.slane %v169_v34, 4 }
 0x222   :  { %v488_v51 = vsel %vm217_vm8, %v468_v59, %v487_v27  ;;  %v493_v54 = vrot.slane %v480_v33, 4  ;;  %v241_v60 = vrot.slane %v181_v44, 4  ;;  %v496_v3 = vsel %vm217_vm8, %v480_v33, %v495_v18 }
 0x223   :  { %v481_v46 = vrot.slane %v464_v36, 4  ;;  %v484_v47 = vsel %vm217_vm8, %v464_v36, %v483_v0  ;;  %v489_v48 = vrot.slane %v476_v37, 4  ;;  %v486_v50 = vsel %vm217_vm8, %v485_v38, %v444_v63 }
 0x224   :  { %v2141_v53 = vsel %vm217_vm8, %v476_v37, %v491_v55  ;;  %v679_v57 = vrot.slane %v484_v47, 4  ;;  %v244_v61 = vsel %vm217_vm8, %v181_v44, %v243_v43  ;;  %v665_v4 = vrot.slane %v486_v50, 4 }
 0x225   :  { %v482_v56 = vsel %vm217_vm8, %v481_v46, %v2085_v45  ;;  %v252_v0 = vperm.slane %v244_v61, %v2056_v2  ;;  %v490_v1 = vsel %vm217_vm8, %v489_v48, %v2076_v39  ;;  %v677_v55 = vrot.slane %v488_v51, 4 }
 0x226   :  { %v667_v63 = vrot.slane %v482_v56, 4  ;;  %v242_v5 = vsel %vm217_vm8, %v241_v60, %v169_v34  ;;  %v703_v6 = vrot.slane %v2141_v53, 4  ;;  %v494_v12 = vsel %vm217_vm8, %v493_v54, %v2092_v52 }
 0x227   :  { %v248_v45 = vperm.slane %v242_v5, %v2056_v2  ;;  %v302_v7 = vsel %vm217_vm8, %v301_v62, %v252_v0  ;;  %v303_v8 = vrot.slane %v252_v0, 4  ;;  %v680_v39 = vsel %vm217_vm8, %v488_v51, %v679_v57 }
 0x228   :  { %v308_v11 = vperm.slane %v302_v7, %v2067_v24  ;;  %v691_v13 = vrot.slane %v490_v1, 4  ;;  %v668_v17 = vsel %vm217_vm8, %v486_v50, %v667_v63  ;;  %v701_v26 = vrot.slane %v496_v3, 4 }
 0x229   :  { %v290_v14 = vsel %vm217_vm8, %v289_v49, %v248_v45  ;;  %v291_v15 = vrot.slane %v248_v45, 4  ;;  %v304_v16 = vsel %vm217_vm8, %v264_v42, %v303_v8  ;;  %v2168_v27 = vperm.slane %v680_v39, %v2056_v2 }
 0x22a   :  { %v296_v18 = vperm.slane %v290_v14, %v2067_v24  ;;  %v312_v22 = vperm.slane %v304_v16, %v2067_v24  ;;  %v321_v23 = vrot.slane %v308_v11, 4  ;;  %v2164_v25 = vsel %vm217_vm8, %v308_v11, %v323_v30 }
 0x22b   :  { %v292_v52 = vsel %vm217_vm8, %v260_v29, %v291_v15  ;;  %v689_v59 = vrot.slane %v494_v12, 4  ;;  %v2179_v33 = vperm.slane %v668_v17, %v2056_v2  ;;  %v591_v36 = vrot.slane %v2164_v25, 4 }
 0x22c   :  { %v300_v28 = vperm.slane %v292_v52, %v2067_v24  ;;  %v2172_v31 = vsel %vm217_vm8, %v296_v18, %v315_v35  ;;  %v2176_v32 = vsel %vm217_vm8, %v321_v23, %v2104_v9  ;;  %v313_v30 = vrot.slane %v296_v18, 4 }
 0x22d   :  { %v325_v34 = vrot.slane %v312_v22, 4  ;;  %v328_v29 = vsel %vm217_vm8, %v312_v22, %v327_v41  ;;  %v567_v37 = vrot.slane %v2172_v31, 4  ;;  %v692_v42 = vsel %vm217_vm8, %v494_v12, %v691_v13 }
 0x22e   :  { %v589_v38 = vrot.slane %v328_v29, 4  ;;  %v704_v35 = vsel %vm217_vm8, %v496_v3, %v703_v6  ;;  %v579_v9 = vrot.slane %v2176_v32, 4  ;;  %v700_v43 = vperm.slane %v692_v42, %v2056_v2 }
 0x22f   :  { %v712_v44 = vperm.slane %v704_v35, %v2056_v2  ;;  %v725_v46 = vrot.slane %v2168_v27, 4  ;;  %v317_v48 = vrot.slane %v300_v28, 4  ;;  %v2192_v41 = vsel %vm217_vm8, %v325_v34, %v2120_v21 }
 0x230   :  { %v666_v49 = vsel %vm217_vm8, %v665_v4, %v482_v56  ;;  %v678_v50 = vsel %vm217_vm8, %v677_v55, %v484_v47  ;;  %v590_v51 = vsel %vm217_vm8, %v589_v38, %v2164_v25  ;;  %v690_v56 = vsel %vm217_vm8, %v689_v59, %v490_v1 }
 0x231   :  { %v726_v54 = vsel %vm217_vm8, %v725_v46, %v2179_v33  ;;  %v749_v57 = vrot.slane %v712_v44, 4  ;;  %v2201_v60 = vperm.slane %v666_v49, %v2056_v2  ;;  %v2207_v21 = vperm.slane %v678_v50, %v2056_v2 }
 0x232   :  { %v2204_v61 = vperm.slane %v726_v54, %v2067_v24  ;;  %v702_v47 = vsel %vm217_vm8, %v701_v26, %v2141_v53  ;;  %v2214_v0 = vperm.slane %v690_v56, %v2056_v2  ;;  %v314_v3 = vsel %vm217_vm8, %v313_v30, %v2114_v19 }
 0x233   :  { %v750_v62 = vsel %vm217_vm8, %v749_v57, %v700_v43  ;;  %v2217_v63 = vperm.slane %v702_v47, %v2056_v2  ;;  %v577_v4 = vrot.slane %v2192_v41, 4  ;;  %v713_v1 = vrot.slane %v2207_v21, 4 }
 0x234   :  { %v2223_v55 = vperm.slane %v750_v62, %v2067_v24  ;;  %v318_v53 = vsel %vm217_vm8, %v317_v48, %v2117_v20  ;;  %v2229_v5 = vperm.slane %v590_v51, %v2056_v2  ;;  %v320_v45 = vsel %vm217_vm8, %v300_v28, %v319_v40 }
 0x235   :  { %v737_v6 = vrot.slane %v2217_v63, 4  ;;  %v555_v19 = vrot.slane %v314_v3, 4  ;;  %v771_v8 = vrot.slane %v2204_v61, 4  ;;  %v553_v11 = vrot.slane %v318_v53, 4 }
 0x236   :  { %v769_v7 = vrot.slane %v2223_v55, 4  ;;  %v568_v12 = vsel %vm217_vm8, %v320_v45, %v567_v37  ;;  %v714_v39 = vsel %vm217_vm8, %v713_v1, %v2201_v60  ;;  %v580_v17 = vsel %vm217_vm8, %v2192_v41, %v579_v9 }
 0x237   :  { %v738_v13 = vsel %vm217_vm8, %v737_v6, %v2214_v0  ;;  %v556_v14 = vsel %vm217_vm8, %v318_v53, %v555_v19  ;;  %v576_v20 = vperm.slane %v568_v12, %v2056_v2  ;;  %v565_v18 = vrot.slane %v320_v45, 4 }
 0x238   :  { %v770_v40 = vsel %vm217_vm8, %v769_v7, %v2204_v61  ;;  %v2247_v15 = vperm.slane %v738_v13, %v2067_v24  ;;  %v564_v16 = vperm.slane %v556_v14, %v2056_v2  ;;  %v588_v22 = vperm.slane %v580_v17, %v2056_v2 }
 0x239   :  { %1758 = vmatpush.xpose.msk.msrb.mxu2 %vm885_vm9, %v770_v40  ;;  %v592_v23 = vsel %vm217_vm8, %v328_v29, %v591_v36  ;;  %v613_v25 = vrot.slane %v576_v20, 4  ;;  %v2256_v26 = vperm.slane %v714_v39, %v2067_v24  ;;  %v727_v37 = vrot.slane %v2179_v33, 4 }
 0x23a   :  { %v761_v52 = vrot.slane %v2247_v15, 4  ;;  %v600_v59 = vperm.slane %v592_v23, %v2056_v2  ;;  %v615_v28 = vrot.slane %v564_v16, 4  ;;  %v639_v34 = vrot.slane %v588_v22, 4 }
 0x23b   :  { %v614_v30 = vsel %vm217_vm8, %v613_v25, %v564_v16  ;;  %v751_v38 = vrot.slane %v700_v43, 4  ;;  %v728_v9 = vsel %vm217_vm8, %v2168_v27, %v727_v37  ;;  %v554_v57 = vsel %vm217_vm8, %v553_v11, %v314_v3 }
 0x23c   :  { %v762_v42 = vsel %vm217_vm8, %v761_v52, %v2256_v26  ;;  %v620_v29 = vperm.slane %v614_v30, %v2067_v24  ;;  %v637_v36 = vrot.slane %v600_v59, 4  ;;  %v616_v35 = vsel %vm217_vm8, %v576_v20, %v615_v28 }
 0x23d   :  { %1759 = vmatmul.msk.f32.vlgmr.msrb.gmra.mxu2 %vm885_vm9, %v762_v42  ;;  %v752_v46 = vsel %vm217_vm8, %v712_v44, %v751_v38  ;;  %v624_v48 = vperm.slane %v616_v35, %v2067_v24  ;;  %v640_v33 = vsel %vm217_vm8, %v600_v59, %v639_v34  ;;  %v736_v49 = vperm.slane %v728_v9, %v2067_v24 }
 0x23e   :  { %v638_v43 = vsel %vm217_vm8, %v637_v36, %v588_v22  ;;  %v659_v41 = vrot.slane %v620_v29, 4  ;;  %v760_v50 = vperm.slane %v752_v46, %v2067_v24  ;;  %v648_v54 = vperm.slane %v640_v33, %v2067_v24 }
 0x23f   :  { %v644_v51 = vperm.slane %v638_v43, %v2067_v24  ;;  %v566_v27 = vsel %vm217_vm8, %v565_v18, %v2172_v31  ;;  %v775_v61 = vrot.slane %v736_v49, 4  ;;  %v560_v56 = vperm.slane %v554_v57, %v2056_v2 }
 0x240   :  { %v773_v44 = vrot.slane %v760_v50, 4  ;;  %v572_v47 = vperm.slane %v566_v27, %v2056_v2  ;;  %v661_v53 = vrot.slane %v648_v54, 4  ;;  %v578_v6 = vsel %vm217_vm8, %v577_v4, %v2176_v32 }
 0x241   :  { %v657_v62 = vrot.slane %v644_v51, 4  ;;  %v660_v1 = vsel %vm217_vm8, %v644_v51, %v659_v41  ;;  %v584_v45 = vperm.slane %v578_v6, %v2056_v2  ;;  %v603_v19 = vrot.slane %v560_v56, 4 }
 0x242   :  { %1760 = vmatpush.xpose.msk.msra.mxu3 %vm885_vm9, %v660_v1  ;;  %v774_v3 = vsel %vm217_vm8, %v773_v44, %v736_v49  ;;  %v601_v31 = vrot.slane %v572_v47, 4  ;;  %v662_v11 = vsel %vm217_vm8, %v661_v53, %v624_v48  ;;  %v625_v12 = vrot.slane %v2229_v5, 4 }
 0x243   :  { %v658_v7 = vsel %vm217_vm8, %v657_v62, %v620_v29  ;;  %v772_v32 = vsel %vm217_vm8, %v2223_v55, %v771_v8  ;;  %1764 = vmatpush.xpose.msk.msra.mxu2 %vm885_vm9, %v662_v11  ;;  %v627_v39 = vrot.slane %v584_v45, 4  ;;  %v776_v13 = vsel %vm217_vm8, %v760_v50, %v775_v61  ;;  %v2345_v62 = vpop.permute.xlu0 %1814 }
 0x244   :  { %1756 = vmatpush.xpose.msk.msrb.mxu1 %vm885_vm9, %v658_v7  ;;  %v602_v4 = vsel %vm217_vm8, %v601_v31, %v560_v56  ;;  %v626_v20 = vsel %vm217_vm8, %v625_v12, %v584_v45  ;;  %v715_v40 = vrot.slane %v2201_v60, 4  ;;  %v604_v55 = vsel %vm217_vm8, %v572_v47, %v603_v19 }
 0x245   :  { %v608_v14 = vperm.slane %v602_v4, %v2067_v24  ;;  %v632_v16 = vperm.slane %v626_v20, %v2067_v24  ;;  %v628_v8 = vsel %vm217_vm8, %v2229_v5, %v627_v39  ;;  %v663_v18 = vrot.slane %v624_v48, 4 }
 0x246   :  { %1766 = vmatpush.xpose.msk.msrb.mxu3 %vm885_vm9, %v774_v3  ;;  %v636_v22 = vperm.slane %v628_v8, %v2067_v24  ;;  %v739_v23 = vrot.slane %v2214_v0, 4  ;;  %v716_v52 = vsel %vm217_vm8, %v2207_v21, %v715_v40  ;;  %v612_v60 = vperm.slane %v604_v55, %v2067_v24 }
 0x247   :  { %1770 = vmatpush.xpose.msk.msrb.mxu2 %vm885_vm9, %v776_v13  ;;  %v651_v17 = vrot.slane %v608_v14, 4  ;;  %v649_v25 = vrot.slane %v632_v16, 4  ;;  %v664_v0 = vsel %vm217_vm8, %v648_v54, %v663_v18  ;;  %v724_v37 = vperm.slane %v716_v52, %v2067_v24 }
 0x248   :  { %1762 = vmatpush.xpose.msk.msra.mxu1 %vm885_vm9, %v772_v32  ;;  %v653_v28 = vrot.slane %v636_v22, 4  ;;  %v740_v30 = vsel %vm217_vm8, %v2217_v63, %v739_v23  ;;  %v763_v63 = vrot.slane %v2256_v26, 4  ;;  %v655_v9 = vrot.slane %v612_v60, 4 }
 0x249   :  { %v652_v59 = vsel %vm217_vm8, %v632_v16, %v651_v17  ;;  %v650_v5 = vsel %vm217_vm8, %v649_v25, %v608_v14  ;;  %v748_v34 = vperm.slane %v740_v30, %v2067_v24  ;;  %v767_v42 = vrot.slane %v724_v37, 4 }
 0x24a   :  { %1761 = vmatmul.msk.f32.vlgmr.msra.gmra.mxu3 %vm885_vm9, %v652_v59  ;;  %1757 = vmatmul.msk.f32.vlgmr.msrb.gmra.mxu1 %vm885_vm9, %v650_v5  ;;  %v654_v21 = vsel %vm217_vm8, %v653_v28, %v612_v60  ;;  %v764_v36 = vsel %vm217_vm8, %v2247_v15, %v763_v63  ;;  %v656_v46 = vsel %vm217_vm8, %v636_v22, %v655_v9 }
 0x24b   :  { %1765 = vmatmul.msk.f32.vlgmr.msra.gmra.mxu2 %vm885_vm9, %v654_v21  ;;  %v765_v38 = vrot.slane %v748_v34, 4  ;;  %v768_v35 = vsel %vm217_vm8, %v748_v34, %v767_v42 }
 0x24c   :  { %1768 = vmatpush.xpose.msk.msrb.mxu1 %vm885_vm9, %v664_v0 }
 0x24d   :  { %v766_v29 = vsel %vm217_vm8, %v765_v38, %v724_v37 }
 0x252   :  { %1767 = vmatmul.msk.f32.vlgmr.msrb.gmra.mxu3 %vm885_vm9, %v766_v29  ;;  %1763 = vmatmul.msk.f32.vlgmr.msra.gmra.mxu1 %vm885_vm9, %v764_v36 }
 0x253   :  { %1771 = vmatmul.msk.f32.vlgmr.msrb.gmra.mxu2 %vm885_vm9, %v768_v35 }
 0x25a   :  { %1769 = vmatmul.msk.f32.vlgmr.msrb.gmra.mxu1 %vm885_vm9, %v656_v46 }
 0x2c0   :  { %v935_v26 = vpop.f32.mrf.mxu2 }
 0x2c1   :  { %v1097_v50 = vsel %vm885_vm9, %v935_v26, -inf }
 0x2c7   :  { %v909_v48 = vpop.f32.mrf.mxu1 }
 0x2c8   :  { %v1094_v33 = vsel %vm885_vm9, %v909_v48, -inf }
 0x2c9   :  { %1095 = vmax.xlane.f32.xlu2 %v1094_v33 }
 0x2cd   :  { %v961_v43 = vpop.f32.mrf.mxu3 }
 0x2ce   :  { %v1100_v15 = vsel %vm885_vm9, %v961_v43, -inf  ;;  %v1013_v41 = vpop.f32.mrf.mxu2 }
 0x2cf   :  { %1101 = vmax.xlane.f32.xlu1 %v1100_v15  ;;  %v987_v49 = vpop.f32.mrf.mxu1  ;;  %v1106_v61 = vsel %vm885_vm9, %v1013_v41, -inf }
 0x2d0   :  { %v1103_v51 = vsel %vm885_vm9, %v987_v49, -inf }
 0x2d1   :  { %1098 = vmax.xlane.f32.xlu2 %v1097_v50  ;;  %1104 = vmax.xlane.f32.xlu0 %v1103_v51 }
 0x2d5   :  { %v1039_v54 = vpop.f32.mrf.mxu3 }
 0x2d6   :  { %v1109_v57 = vsel %vm885_vm9, %v1039_v54, -inf  ;;  %v1091_v27 = vpop.f32.mrf.mxu2 }
 0x2d7   :  { %1110 = vmax.xlane.f32.xlu1 %v1109_v57  ;;  %v1115_v44 = vsel %vm885_vm9, %v1091_v27, -inf  ;;  %v1065_v56 = vpop.f32.mrf.mxu1 }
 0x2d8   :  { %v1112_v47 = vsel %vm885_vm9, %v1065_v56, -inf }
 0x2d9   :  { %1107 = vmax.xlane.f32.xlu2 %v1106_v61  ;;  %1116 = vmax.xlane.f32.xlu0 %v1115_v44 }
 0x2df   :  { %1113 = vmax.xlane.f32.xlu1 %v1112_v47 }
 0x2ed   :  { %1829 = vrot.lane.b32.xlu0 %v2050_v58, %s1926_s30 }
 0x2f1   :  { %1819 = vrot.lane.b32.xlu2 %v2050_v58, %s1927_s14 }
 0x2f8   :  { %1824 = vrot.lane.b32.xlu1 %v2050_v58, %s1928_s15 }
 0x33c   :  { %v1096_v1 = vpop.xlane.xlu2 %1095 }
 0x33d   :  { %v1118_v53 = vsub.f32 %v909_v48, %v1096_v1 }
 0x33f   :  { %v1126_v6 = vmul.f32 1.442695, %v1118_v53 }
 0x341   :  { %1847 = vpow2.f32 %v1126_v6 }
 0x342   :  { %v1102_v3 = vpop.xlane.xlu1 %1101 }
 0x343   :  { %v1120_v45 = vsub.f32 %v961_v43, %v1102_v3 }
 0x344   :  { %v1099_v19 = vpop.xlane.xlu2 %1098  ;;  %v1105_v7 = vpop.xlane.xlu0 %1104 }
 0x345   :  { %v1130_v31 = vmul.f32 1.442695, %v1120_v45  ;;  %v1121_v11 = vsub.f32 %v987_v49, %v1105_v7  ;;  %v1119_v20 = vsub.f32 %v935_v26, %v1099_v19  ;;  %v1816_v49 = vunpack.i.l.bf16 %v2345_v62 }
 0x347   :  { %1849 = vpow2.f32 %v1130_v31  ;;  %v2347_v12 = vpop.eup %1847  ;;  %v1132_v32 = vmul.f32 1.442695, %v1121_v11  ;;  %v1128_v22 = vmul.f32 1.442695, %v1119_v20  ;;  %v331_v61 = vrot.slane %v1816_v49, 4 }
 0x348   :  { %v1142_v4 = vsel %vm885_vm9, %v2347_v12, 0.0 }
 0x349   :  { %1143 = vadd.xlane.f32.xlu2 %v1142_v4  ;;  %1851 = vpow2.f32 %v1132_v32 }
 0x34a   :  { %v1111_v58 = vpop.xlane.xlu1 %1110 }
 0x34b   :  { %v1123_v59 = vsub.f32 %v1039_v54, %v1111_v58 }
 0x34c   :  { %v1108_v13 = vpop.xlane.xlu2 %1107  ;;  %v1117_v14 = vpop.xlane.xlu0 %1116 }
 0x34d   :  { %v2351_v39 = vpop.eup %1849  ;;  %v1122_v40 = vsub.f32 %v1013_v41, %v1108_v13  ;;  %v1125_v16 = vsub.f32 %v1091_v27, %v1117_v14  ;;  %v1136_v5 = vmul.f32 1.442695, %v1123_v59  ;;  %v1817_v41 = vunpack.i.h.bf16 %v2345_v62 }
 0x34e   :  { %v1148_v55 = vsel %vm885_vm9, %v2351_v39, 0.0 }
 0x34f   :  { %1149 = vadd.xlane.f32.xlu0 %v1148_v55  ;;  %v1134_v8 = vmul.f32 1.442695, %v1122_v40  ;;  %v1140_v17 = vmul.f32 1.442695, %v1125_v16  ;;  %v2355_v18 = vpop.eup %1851  ;;  %v499_v44 = vrot.slane %v1817_v41, 4 }
 0x350   :  { %v1151_v23 = vsel %vm885_vm9, %v2355_v18, 0.0 }
 0x351   :  { %1853 = vpow2.f32 %v1134_v8  ;;  %1152 = vadd.xlane.f32.xlu1 %v1151_v23 }
 0x352   :  { %v1114_v25 = vpop.xlane.xlu1 %1113  ;;  %1855 = vpow2.f32 %v1140_v17 }
 0x353   :  { %v1124_v52 = vsub.f32 %v1065_v56, %v1114_v25  ;;  %1857 = vpow2.f32 %v1128_v22 }
 0x354   :  { %v1820_v38 = vpop.permute.xlu2 %1819 }
 0x355   :  { %v1138_v60 = vmul.f32 1.442695, %v1124_v52  ;;  %v1822_v36 = vunpack.i.h.bf16 %v1820_v38  ;;  %v1821_v35 = vunpack.i.l.bf16 %v1820_v38 }
 0x357   :  { %1859 = vpow2.f32 %v1138_v60  ;;  %v2359_v28 = vpop.eup %1853  ;;  %v511_v43 = vrot.slane %v1822_v36, 4  ;;  %v343_v15 = vrot.slane %v1821_v35, 4 }
 0x358   :  { %v2361_v30 = vpop.eup %1855  ;;  %v1154_v34 = vsel %vm885_vm9, %v2359_v28, 0.0  ;;  %1861 = vpow2.f32 %v1136_v5 }
 0x359   :  { %1155 = vadd.xlane.f32.xlu2 %v1154_v34  ;;  %v1163_v0 = vsel %vm885_vm9, %v2361_v30, 0.0  ;;  %v2367_v21 = vpop.eup %1857 }
 0x35a   :  { %1164 = vadd.xlane.f32.xlu1 %v1163_v0  ;;  %v1145_v29 = vsel %vm885_vm9, %v2367_v21, 0.0 }
 0x35d   :  { %v2369_v37 = vpop.eup %1859 }
 0x35e   :  { %v1160_v63 = vsel %vm885_vm9, %v2369_v37, 0.0  ;;  %v2375_v26 = vpop.eup %1861 }
 0x35f   :  { %1161 = vadd.xlane.f32.xlu0 %v1160_v63  ;;  %v1830_v42 = vpop.permute.xlu0 %1829  ;;  %v1157_v50 = vsel %vm885_vm9, %v2375_v26, 0.0 }
 0x360   :  { %v1832_v9 = vunpack.i.h.bf16 %v1830_v42  ;;  %v1831_v46 = vunpack.i.l.bf16 %v1830_v42 }
 0x361   :  { %1146 = vadd.xlane.f32.xlu2 %v1145_v29 }
 0x362   :  { %v509_v48 = vrot.slane %v1832_v9, 4  ;;  %v341_v33 = vrot.slane %v1831_v46, 4  ;;  %v512_v51 = vsel %vm217_vm8, %v1832_v9, %v511_v43  ;;  %v344_v54 = vsel %vm217_vm8, %v1831_v46, %v343_v15 }
 0x363   :  { %v520_v56 = vperm.slane %v512_v51, %v2056_v2  ;;  %v352_v47 = vperm.slane %v344_v54, %v2056_v2 }
 0x364   :  { %v510_v57 = vsel %vm217_vm8, %v509_v48, %v1822_v36  ;;  %v342_v27 = vsel %vm217_vm8, %v341_v33, %v1821_v35 }
 0x365   :  { %v516_v62 = vperm.slane %v510_v57, %v2056_v2  ;;  %v348_v53 = vperm.slane %v342_v27, %v2056_v2  ;;  %v533_v11 = vrot.slane %v520_v56, 4  ;;  %v365_v32 = vrot.slane %v352_v47, 4 }
 0x367   :  { %1158 = vadd.xlane.f32.xlu0 %v1157_v50  ;;  %v521_v13 = vrot.slane %v516_v62, 4  ;;  %v353_v14 = vrot.slane %v348_v53, 4 }
 0x36a   :  { %v1825_v1 = vpop.permute.xlu1 %1824 }
 0x36b   :  { %v1827_v6 = vunpack.i.h.bf16 %v1825_v1  ;;  %v1826_v3 = vunpack.i.l.bf16 %v1825_v1 }
 0x36d   :  { %v497_v45 = vrot.slane %v1827_v6, 4  ;;  %v500_v31 = vsel %vm217_vm8, %v1827_v6, %v499_v44  ;;  %v329_v19 = vrot.slane %v1826_v3, 4  ;;  %v332_v7 = vsel %vm217_vm8, %v1826_v3, %v331_v61 }
 0x36e   :  { %v508_v4 = vperm.slane %v500_v31, %v2056_v2  ;;  %v340_v58 = vperm.slane %v332_v7, %v2056_v2 }
 0x36f   :  { %v498_v20 = vsel %vm217_vm8, %v497_v45, %v1817_v41  ;;  %v330_v40 = vsel %vm217_vm8, %v329_v19, %v1816_v49 }
 0x370   :  { %v504_v16 = vperm.slane %v498_v20, %v2056_v2  ;;  %v534_v55 = vsel %vm217_vm8, %v533_v11, %v508_v4  ;;  %v535_v8 = vrot.slane %v508_v4, 4  ;;  %v336_v17 = vperm.slane %v330_v40, %v2056_v2 }
 0x371   :  { %v540_v22 = vperm.slane %v534_v55, %v2067_v24  ;;  %v366_v23 = vsel %vm217_vm8, %v365_v32, %v340_v58  ;;  %v367_v25 = vrot.slane %v340_v58, 4 }
 0x372   :  { %v522_v52 = vsel %vm217_vm8, %v521_v13, %v504_v16  ;;  %v523_v59 = vrot.slane %v504_v16, 4  ;;  %v536_v60 = vsel %vm217_vm8, %v520_v56, %v535_v8  ;;  %v354_v5 = vsel %vm217_vm8, %v353_v14, %v336_v17 }
 0x373   :  { %v528_v34 = vperm.slane %v522_v52, %v2067_v24  ;;  %v544_v0 = vperm.slane %v536_v60, %v2067_v24  ;;  %v549_v38 = vrot.slane %v540_v22, 4  ;;  %v355_v63 = vrot.slane %v336_v17, 4 }
 0x374   :  { %v524_v42 = vsel %vm217_vm8, %v516_v62, %v523_v59  ;;  %v360_v29 = vperm.slane %v354_v5, %v2067_v24  ;;  %v368_v36 = vsel %vm217_vm8, %v352_v47, %v367_v25  ;;  %v372_v35 = vperm.slane %v366_v23, %v2067_v24 }
 0x375   :  { %v545_v9 = vrot.slane %v528_v34, 4  ;;  %v551_v46 = vrot.slane %v544_v0, 4  ;;  %v356_v48 = vsel %vm217_vm8, %v348_v53, %v355_v63  ;;  %v376_v43 = vperm.slane %v368_v36, %v2067_v24 }
 0x376   :  { %v364_v33 = vperm.slane %v356_v48, %v2067_v24  ;;  %v377_v15 = vrot.slane %v360_v29, 4  ;;  %v381_v41 = vrot.slane %v372_v35, 4  ;;  %v550_v49 = vsel %vm217_vm8, 0.0, %v549_v38 }
 0x377   :  { %v552_v50 = vsel %vm217_vm8, 0.0, %v551_v46  ;;  %v532_v51 = vperm.slane %v524_v42, %v2067_v24  ;;  %v842_v54 = vsel %vm217_vm8, %v551_v46, %v540_v22  ;;  %v383_v44 = vrot.slane %v376_v43, 4 }
 0x378   :  { %v847_v57 = vrot.slane %v552_v50, 4  ;;  %v379_v27 = vrot.slane %v364_v33, 4  ;;  %v546_v61 = vsel %vm217_vm8, 0.0, %v545_v9  ;;  %v382_v56 = vsel %vm217_vm8, 0.0, %v381_v41 }
 0x379   :  { %v378_v47 = vsel %vm217_vm8, 0.0, %v377_v15  ;;  %v547_v1 = vrot.slane %v532_v51, 4  ;;  %v846_v62 = vperm.slane %v842_v54, %v2056_v2  ;;  %v384_v6 = vsel %vm217_vm8, 0.0, %v383_v44 }
 0x37a   :  { %v380_v53 = vsel %vm217_vm8, 0.0, %v379_v27  ;;  %v777_v3 = vsel %vm217_vm8, %v379_v27, %v360_v29  ;;  %v788_v45 = vsel %vm217_vm8, %v383_v44, %v372_v35  ;;  %v793_v19 = vrot.slane %v384_v6, 4 }
 0x37b   :  { %v782_v31 = vrot.slane %v380_v53, 4  ;;  %v781_v7 = vperm.slane %v777_v3, %v2056_v2  ;;  %v792_v11 = vperm.slane %v788_v45, %v2056_v2  ;;  %v548_v32 = vsel %vm217_vm8, 0.0, %v547_v1 }
 0x37c   :  { %v831_v4 = vsel %vm217_vm8, %v547_v1, %v528_v34  ;;  %v848_v58 = vsel %vm217_vm8, %v847_v57, %v550_v49  ;;  %v867_v13 = vrot.slane %v846_v62, 4  ;;  %v794_v20 = vsel %vm217_vm8, %v793_v19, %v382_v56 }
 0x37d   :  { %v783_v14 = vsel %vm217_vm8, %v782_v31, %v378_v47  ;;  %v835_v40 = vperm.slane %v831_v4, %v2056_v2  ;;  %v836_v16 = vrot.slane %v548_v32, 4  ;;  %v798_v8 = vperm.slane %v794_v20, %v2056_v2 }
 0x37e   :  { %v787_v55 = vperm.slane %v783_v14, %v2056_v2  ;;  %v852_v17 = vperm.slane %v848_v58, %v2056_v2  ;;  %v801_v22 = vrot.slane %v781_v7, 4  ;;  %v813_v25 = vrot.slane %v792_v11, 4 }
 0x37f   :  { %v837_v23 = vsel %vm217_vm8, %v836_v16, %v546_v61  ;;  %v855_v52 = vrot.slane %v835_v40, 4  ;;  %v811_v60 = vrot.slane %v798_v8, 4 }
 0x380   :  { %v799_v59 = vrot.slane %v787_v55, 4  ;;  %v841_v5 = vperm.slane %v837_v23, %v2056_v2  ;;  %v865_v34 = vrot.slane %v852_v17, 4  ;;  %v802_v0 = vsel %vm217_vm8, %v787_v55, %v801_v22 }
 0x381   :  { %v814_v38 = vsel %vm217_vm8, %v798_v8, %v813_v25  ;;  %v868_v63 = vsel %vm217_vm8, %v852_v17, %v867_v13  ;;  %v812_v29 = vsel %vm217_vm8, %v811_v60, %v792_v11  ;;  %v810_v48 = vperm.slane %v802_v0, %v2067_v24  ;;  %v1366_v60 = vld [vmem:[%s2658_s5] sm:$0xff] }
 0x382   :  { %v800_v42 = vsel %vm217_vm8, %v799_v59, %v781_v7  ;;  %v853_v36 = vrot.slane %v841_v5, 4  ;;  %v866_v35 = vsel %vm217_vm8, %v865_v34, %v846_v62  ;;  %v818_v46 = vperm.slane %v812_v29, %v2067_v24 }
 0x383   :  { %v806_v9 = vperm.slane %v800_v42, %v2067_v24  ;;  %v872_v2 = vperm.slane %v866_v35, %v2067_v24  ;;  %v822_v43 = vperm.slane %v814_v38, %v2067_v24  ;;  %v856_v15 = vsel %vm217_vm8, %v841_v5, %v855_v52 }
 0x384   :  { %v854_v33 = vsel %vm217_vm8, %v853_v36, %v835_v40  ;;  %v876_v41 = vperm.slane %v868_v63, %v2067_v24  ;;  %v823_v49 = vrot.slane %v818_v46, 4  ;;  %v864_v54 = vperm.slane %v856_v15, %v2067_v24 }
 0x385   :  { %v860_v50 = vperm.slane %v854_v33, %v2067_v24  ;;  %v877_v51 = vrot.slane %v872_v2, 4  ;;  %v827_v57 = vrot.slane %v822_v43, 4  ;;  %v825_v44 = vrot.slane %v806_v9, 4 }
 0x386   :  { %v881_v27 = vrot.slane %v876_v41, 4  ;;  %v829_v61 = vrot.slane %v810_v48, 4  ;;  %v824_v56 = vsel %vm217_vm8, %v823_v49, %v806_v9  ;;  %v883_v62 = vrot.slane %v864_v54, 4  ;;  %v1836_v49 = vld [vmem:[%s2659_s6] ss:$0 sm:$0xff] }
 0x387   :  { %v878_v47 = vsel %vm217_vm8, %v877_v51, %v860_v50  ;;  %v879_v1 = vrot.slane %v860_v50, 4  ;;  %1200 = vmatpush.msra.mxu3 %v824_v56  ;;  %v828_v53 = vsel %vm217_vm8, %v827_v57, %v810_v48  ;;  %v826_v3 = vsel %vm217_vm8, %v818_v46, %v825_v44 }
 0x388   :  { %1223 = vmatpush.msra.mxu0 %v878_v47  ;;  %v882_v6 = vsel %vm217_vm8, %v881_v27, %v864_v54  ;;  %1246 = vmatpush.msra.mxu1 %v826_v3  ;;  %v830_v45 = vsel %vm217_vm8, %v822_v43, %v829_v61  ;;  %v884_v31 = vsel %vm217_vm8, %v876_v41, %v883_v62  ;;  %v1887_v62 = vld [vmem:[%s2653_s0] sm:$0xff] }
 0x389   :  { %1292 = vmatpush.msrb.mxu3 %v828_v53  ;;  %v880_v24 = vsel %vm217_vm8, %v872_v2, %v879_v1 }
 0x38a   :  { %1315 = vmatpush.msrb.mxu0 %v882_v6  ;;  %1269 = vmatpush.msra.mxu2 %v880_v24 }
 0x38b   :  { %1338 = vmatpush.msrb.mxu1 %v830_v45 }
 0x38c   :  { %1361 = vmatpush.msrb.mxu2 %v884_v31 }
 0x3bc   :  { %v1144_v19 = vpop.xlane.xlu2 %1143 }
 0x3bd   :  { %1863 = vrcp.f32 %v1144_v19 }
 0x3c2   :  { %v1150_v7 = vpop.xlane.xlu0 %1149 }
 0x3c3   :  { %1865 = vrcp.f32 %v1150_v7  ;;  %v1864_v11 = vpop.eup %1863  ;;  %v1888_v7 = vld [vmem:[%s2653_s0 + $0x8] sm:$0xff] }
 0x3c4   :  { %v1174_v32 = vmul.f32 %v1864_v11, %v2347_v12  ;;  %v1153_v4 = vpop.xlane.xlu1 %1152 }
 0x3c5   :  { %1867 = vrcp.f32 %v1153_v4 }
 0x3c6   :  { %1772 = vmatmul.msk.f32.vlgmr.msra.gmra.mxu3 %vm885_vm9, %v1174_v32 }
 0x3c7   :  { %1391 = vmatpush.msra.mxu3 %v1366_v60 }
 0x3c9   :  { %v1866_v58 = vpop.eup %1865 }
 0x3ca   :  { %v1176_v13 = vmul.f32 %v1866_v58, %v2351_v39 }
 0x3cb   :  { %v1868_v14 = vpop.eup %1867 }
 0x3cc   :  { %1774 = vmatmul.msk.f32.vlgmr.msra.gmra.mxu1 %vm885_vm9, %v1176_v13  ;;  %v1156_v20 = vpop.xlane.xlu2 %1155  ;;  %v1177_v40 = vmul.f32 %v1868_v14, %v2355_v18 }
 0x3cd   :  { %1869 = vrcp.f32 %v1156_v20  ;;  %v1165_v16 = vpop.xlane.xlu1 %1164 }
 0x3ce   :  { %1871 = vrcp.f32 %v1165_v16  ;;  %1775 = vmatmul.msk.f32.vlgmr.msra.gmra.mxu2 %vm885_vm9, %v1177_v40 }
 0x3d2   :  { %v1162_v55 = vpop.xlane.xlu0 %1161 }
 0x3d3   :  { %1873 = vrcp.f32 %v1162_v55  ;;  %v1870_v12 = vpop.eup %1869 }
 0x3d4   :  { %v1872_v8 = vpop.eup %1871  ;;  %v1178_v17 = vmul.f32 %v1870_v12, %v2359_v28  ;;  %v1147_v22 = vpop.xlane.xlu2 %1146 }
 0x3d5   :  { %v1181_v39 = vmul.f32 %v1872_v8, %v2361_v30  ;;  %1875 = vrcp.f32 %v1147_v22  ;;  %v1566_v22 = vld [vmem:[%s2662_s9 + $0x10] sm:$0xff] }
 0x3d6   :  { %1776 = vmatmul.msk.f32.vlgmr.msrb.gmra.mxu3 %vm885_vm9, %v1178_v17  ;;  %v1567_v17 = vld [vmem:[%s2662_s9 + $0x18] sm:$0xff] }
 0x3d7   :  { %1779 = vmatmul.msk.f32.vlgmr.msrb.gmra.mxu2 %vm885_vm9, %v1181_v39  ;;  %1590 = vmatpush.msrb.mxu3 %v1567_v17 }
 0x3d9   :  { %v1874_v18 = vpop.eup %1873  ;;  %1591 = vmatpush.msrb.mxu3 %v1566_v22 }
 0x3da   :  { %v1180_v23 = vmul.f32 %v1874_v18, %v2369_v37  ;;  %v1159_v25 = vpop.xlane.xlu0 %1158  ;;  %v1367_v37 = vld [vmem:[%s2658_s5 + $0x8] sm:$0xff] }
 0x3db   :  { %v1876_v52 = vpop.eup %1875  ;;  %1877 = vrcp.f32 %v1159_v25  ;;  %v1565_v18 = vld [vmem:[%s2662_s9 + $0x8] sm:$0xff]  ;;  %v1564_v25 = vld [vmem:[%s2662_s9] sm:$0xff] }
 0x3dc   :  { %1778 = vmatmul.msk.f32.vlgmr.msrb.gmra.mxu1 %vm885_vm9, %v1180_v23  ;;  %v1175_v59 = vmul.f32 %v1876_v52, %v2367_v21  ;;  %v1369_v21 = vld [vmem:[%s2658_s5 + $0x18] sm:$0xff]  ;;  %1592 = vmatpush.msrb.mxu3 %v1565_v18 }
 0x3dd   :  { %1478 = vmatpush.msra.mxu2 %v1369_v21  ;;  %v1696_v18 = vld [vmem:[%s2664_s11 + $0x38] sm:$0xff] }
 0x3de   :  { %1773 = vmatmul.msk.f32.vlgmr.msra.gmra.mxu0 %vm885_vm9, %v1175_v59  ;;  %1593 = vmatpush.msrb.mxu3 %v1564_v25 }
 0x3df   :  { %1420 = vmatpush.msra.mxu0 %v1367_v37 }
 0x3e1   :  { %v1878_v28 = vpop.eup %1877 }
 0x3e2   :  { %v1179_v30 = vmul.f32 %v1878_v28, %v2375_v26  ;;  %v1368_v26 = vld [vmem:[%s2658_s5 + $0x10] sm:$0xff] }
 0x3e3   :  { %1449 = vmatpush.msra.mxu1 %v1368_v26 }
 0x3e6   :  { %1777 = vmatmul.msk.f32.vlgmr.msrb.gmra.mxu0 %vm885_vm9, %v1179_v30 }
 0x449   :  { %v1248_v5 = vpop.f32.mrf.mxu1  ;;  %v1202_v34 = vpop.f32.mrf.mxu3 }
 0x44a   :  { %1782 = vmatmul.msk.f32.vlgmr.msra.gmra.mxu0 %vm885_vm9, %v1248_v5  ;;  %1780 = vmatmul.msk.f32.vlgmr.msra.gmra.mxu3 %vm885_vm9, %v1202_v34 }
 0x451   :  { %v1271_v0 = vpop.f32.mrf.mxu2 }
 0x452   :  { %1783 = vmatmul.msk.f32.gmra.mxu0 %vm885_vm9, %v1271_v0 }
 0x459   :  { %v1340_v38 = vpop.f32.mrf.mxu1  ;;  %v1294_v63 = vpop.f32.mrf.mxu3 }
 0x45a   :  { %1786 = vmatmul.msk.f32.vlgmr.msra.gmra.mxu2 %vm885_vm9, %v1340_v38  ;;  %1784 = vmatmul.msk.f32.vlgmr.msra.gmra.mxu1 %vm885_vm9, %v1294_v63  ;;  %v1363_v29 = vpop.f32.mrf.mxu2  ;;  %v1837_v63 = vld [vmem:[%s2660_s7] ss:$0 sm:$0xff] }
 0x45b   :  { %v1225_v42 = vpop.f32.mrf.mxu0 }
 0x45c   :  { %1781 = vmatmul.msk.f32.gmra.mxu3 %vm885_vm9, %v1225_v42 }
 0x462   :  { %1787 = vmatmul.msk.f32.gmra.mxu2 %vm885_vm9, %v1363_v29 }
 0x463   :  { %v1317_v36 = vpop.f32.mrf.mxu0 }
 0x464   :  { %1785 = vmatmul.msk.f32.gmra.mxu1 %vm885_vm9, %v1317_v36  ;;  %v1838_v36 = vld [vmem:[%s2661_s8] ss:$0 sm:$0xff] }
 0x4c7   :  { %v1422_v35 = vpop.f32.mrf.mxu0 }
 0x4c8   :  { %v1487_v48 = vsel %vm49_vm0, %v1422_v35, 0.0 }
 0x4cd   :  { %v1393_v9 = vpop.f32.mrf.mxu3 }
 0x4ce   :  { %v1486_v46 = vsel %vm49_vm0, %v1393_v9, 0.0 }
 0x4cf   :  { %v1488_v43 = vadd.f32 %v1487_v48, %v1486_v46  ;;  %v1425_v50 = vpop.f32.mrf.mxu0 }
 0x4d0   :  { %v1494_v27 = vsel %vm49_vm0, %v1425_v50, 0.0 }
 0x4d7   :  { %v1451_v2 = vpop.f32.mrf.mxu1 }
 0x4d8   :  { %v1489_v33 = vsel %vm49_vm0, %v1451_v2, 0.0 }
 0x4d9   :  { %v1490_v15 = vadd.f32 %v1489_v33, %v1488_v43 }
 0x4dd   :  { %v1480_v41 = vpop.f32.mrf.mxu2 }
 0x4de   :  { %v1491_v51 = vsel %vm49_vm0, %v1480_v41, 0.0 }
 0x4df   :  { %v1492_v54 = vadd.f32 %v1491_v51, %v1490_v15  ;;  %v1396_v57 = vpop.f32.mrf.mxu3 }
 0x4e0   :  { %v1493_v61 = vsel %vm49_vm0, %v1396_v57, 0.0  ;;  %v1704_v57 = vld [vmem:[%s2664_s11 + $0x78] sm:$0xff] }
 0x4e1   :  { %v1504_v44 = vadd.f32 %v1836_v49, %v1492_v54  ;;  %v1495_v56 = vadd.f32 %v1494_v27, %v1493_v61  ;;  %v1454_v47 = vpop.f32.mrf.mxu1  ;;  %1709 = vmatpush.msrb.mxu0 %v1704_v57 }
 0x4e2   :  { %v1496_v1 = vsel %vm49_vm0, %v1454_v47, 0.0  ;;  %v1702_v47 = vld [vmem:[%s2664_s11 + $0x68] sm:$0xff] }
 0x4e3   :  { %v2510_v53 = vadd.f32 %v1887_v62, %v1504_v44  ;;  %v1497_v6 = vadd.f32 %v1496_v1, %v1495_v56  ;;  %v1703_v44 = vld [vmem:[%s2664_s11 + $0x70] sm:$0xff] }
 0x4e4   :  { %1710 = vmatpush.msrb.mxu0 %v1703_v44 }
 0x4e5   :  { %v1483_v3 = vpop.f32.mrf.mxu2  ;;  %v1510_v24 = vsel %vm49_vm0, %v2510_v53, 0.0 }
 0x4e6   :  { %v1498_v45 = vsel %vm49_vm0, %v1483_v3, 0.0  ;;  %1511 = vadd.xlane.f32.xlu1 %v1510_v24  ;;  %1711 = vmatpush.msrb.mxu0 %v1702_v47  ;;  %v1701_v3 = vld [vmem:[%s2664_s11 + $0x60] sm:$0xff] }
 0x4e7   :  { %v1499_v31 = vadd.f32 %v1498_v45, %v1497_v6 }
 0x4e8   :  { %1712 = vmatpush.msrb.mxu0 %v1701_v3 }
 0x4e9   :  { %v1505_v19 = vadd.f32 %v1836_v49, %v1499_v31  ;;  %v1839_v49 = vld [vmem:[%s2663_s10] ss:$0 sm:$0xff] }
 0x4eb   :  { %v2518_v11 = vadd.f32 %v1888_v7, %v1505_v19  ;;  %v1700_v19 = vld [vmem:[%s2664_s11 + $0x58] sm:$0xff] }
 0x4ec   :  { %1713 = vmatpush.msrb.mxu0 %v1700_v19 }
 0x4ed   :  { %v1513_v32 = vsel %vm49_vm0, %v2518_v11, 0.0 }
 0x4ee   :  { %1514 = vadd.xlane.f32.xlu2 %v1513_v32 }
 0x559   :  { %v1512_v4 = vpop.xlane.xlu1 %1511 }
 0x55a   :  { %v1516_v58 = vmul.f32 %v1512_v4, %v2010_v10 }
 0x55c   :  { %v1518_v13 = vsub.f32 %v2510_v53, %v1516_v58  ;;  %v1699_v58 = vld [vmem:[%s2664_s11 + $0x50] sm:$0xff] }
 0x55d   :  { %1714 = vmatpush.msrb.mxu0 %v1699_v58 }
 0x55e   :  { %v1520_v14 = vmul.f32 %v1518_v13, %v1518_v13 }
 0x560   :  { %v1522_v20 = vsel %vm49_vm0, %v1520_v14, 0.0 }
 0x561   :  { %1523 = vadd.xlane.f32.xlu0 %v1522_v20  ;;  %v1515_v40 = vpop.xlane.xlu2 %1514 }
 0x562   :  { %v1517_v16 = vmul.f32 %v1515_v40, %v2010_v10  ;;  %v1698_v40 = vld [vmem:[%s2664_s11 + $0x48] sm:$0xff] }
 0x563   :  { %1715 = vmatpush.msrb.mxu0 %v1698_v40 }
 0x564   :  { %v1519_v55 = vsub.f32 %v2518_v11, %v1517_v16 }
 0x566   :  { %v1521_v12 = vmul.f32 %v1519_v55, %v1519_v55 }
 0x568   :  { %v1525_v8 = vsel %vm49_vm0, %v1521_v12, 0.0  ;;  %v1697_v12 = vld [vmem:[%s2664_s11 + $0x40] sm:$0xff] }
 0x569   :  { %1526 = vadd.xlane.f32.xlu1 %v1525_v8  ;;  %1716 = vmatpush.msrb.mxu0 %v1697_v12 }
 0x56b   :  { %1717 = vmatpush.msrb.mxu0 %v1696_v18 }
 0x5d4   :  { %v1524_v39 = vpop.xlane.xlu0 %1523 }
 0x5d5   :  { %v1528_v23 = vmul.f32 %v1524_v39, %v2010_v10 }
 0x5d7   :  { %v1530_v52 = vadd.f32 1e-12, %v1528_v23  ;;  %v1695_v23 = vld [vmem:[%s2664_s11 + $0x30] sm:$0xff] }
 0x5d8   :  { %1718 = vmatpush.msrb.mxu0 %v1695_v23 }
 0x5d9   :  { %1879 = vrsqrt.f32 %v1530_v52  ;;  %vm1538_vm11 = vweird.f32 %v1530_v52 }
 0x5dc   :  { %v1527_v59 = vpop.xlane.xlu1 %1526 }
 0x5dd   :  { %v1529_v28 = vmul.f32 %v1527_v59, %v2010_v10  ;;  %v1694_v59 = vld [vmem:[%s2664_s11 + $0x28] sm:$0xff] }
 0x5de   :  { %1719 = vmatpush.msrb.mxu0 %v1694_v59 }
 0x5df   :  { %v1880_v30 = vpop.eup %1879  ;;  %v1531_v60 = vadd.f32 1e-12, %v1529_v28 }
 0x5e0   :  { %v1533_v37 = vmul.f32 %v1880_v30, %v1530_v52  ;;  %vm1539_vm10 = vweird.f32 %v1880_v30 }
 0x5e1   :  { %1881 = vrsqrt.f32 %v1531_v60  ;;  %vm1540_vm12 = vmor %vm1538_vm11, %vm1539_vm10  ;;  %vm1548_vm14 = vweird.f32 %v1531_v60 }
 0x5e2   :  { %v1534_v21 = vmul.f32 %v1880_v30, %v1533_v37 }
 0x5e4   :  { %v1535_v26 = vmul.f32 0.5, %v1534_v21  ;;  %v1693_v21 = vld [vmem:[%s2664_s11 + $0x20] sm:$0xff] }
 0x5e5   :  { %1720 = vmatpush.msrb.mxu0 %v1693_v21 }
 0x5e6   :  { %v1536_v5 = vsub.f32 1.5, %v1535_v26 }
 0x5e7   :  { %v1882_v34 = vpop.eup %1881 }
 0x5e8   :  { %v1537_v0 = vmul.f32 %v1880_v30, %v1536_v5  ;;  %v1543_v38 = vmul.f32 %v1882_v34, %v1531_v60  ;;  %vm1549_vm13 = vweird.f32 %v1882_v34 }
 0x5e9   :  { %vm1550_vm15 = vmor %vm1548_vm14, %vm1549_vm13 }
 0x5ea   :  { %v1541_v42 = vsel %vm1540_vm12, %v1880_v30, %v1537_v0  ;;  %v1544_v29 = vmul.f32 %v1882_v34, %v1543_v38 }
 0x5eb   :  { %v1552_v10 = vmul.f32 %v1541_v42, %v1518_v13 }
 0x5ec   :  { %v1545_v35 = vmul.f32 0.5, %v1544_v29  ;;  %v1691_v29 = vld [vmem:[%s2664_s11 + $0x10] sm:$0xff] }
 0x5ed   :  { %v1557_v9 = vmul.f32 %v1837_v63, %v1552_v10  ;;  %v1690_v10 = vld [vmem:[%s2664_s11 + $0x8] sm:$0xff] }
 0x5ee   :  { %v1546_v46 = vsub.f32 1.5, %v1545_v35 }
 0x5ef   :  { %v1562_v2 = vadd.f32 %v1838_v36, %v1557_v9 }
 0x5f0   :  { %v1547_v48 = vmul.f32 %v1882_v34, %v1546_v46  ;;  %v1689_v46 = vld [vmem:[%s2664_s11] sm:$0xff] }
 0x5f1   :  { %1788 = vmatmul.msk.f32.vlgmr.msrb.gmra.mxu3 %vm49_vm0, %v1562_v2 }
 0x5f2   :  { %v1551_v33 = vsel %vm1550_vm15, %v1882_v34, %v1547_v48  ;;  %v1692_v34 = vld [vmem:[%s2664_s11 + $0x18] sm:$0xff] }
 0x5f3   :  { %v1553_v43 = vmul.f32 %v1551_v33, %v1519_v55  ;;  %1721 = vmatpush.msrb.mxu0 %v1692_v34 }
 0x5f5   :  { %v1558_v15 = vmul.f32 %v1837_v63, %v1553_v43  ;;  %1722 = vmatpush.msrb.mxu0 %v1691_v29 }
 0x5f7   :  { %v1563_v41 = vadd.f32 %v1838_v36, %v1558_v15  ;;  %1723 = vmatpush.msrb.mxu0 %v1690_v10 }
 0x5f9   :  { %1789 = vmatmul.msk.f32.gmra.mxu3 %vm49_vm0, %v1563_v41  ;;  %1724 = vmatpush.msrb.mxu0 %v1689_v46 }
 0x674   :  { %v1595_v50 = vpop.f32.mrf.mxu3 }
 0x675   :  { %v2553_v51 = vadd.f32 %v1839_v49, %v1595_v50 }
 0x677   :  { %v2556_v54 = vmul.f32 0.70710677, %v2553_v51  ;;  %v1601_v40 = vmul.f32 0.5, %v2553_v51 }
 0x679   :  { %v1605_v27 = vmul.f32 %v2556_v54, %v2556_v54 }
 0x67b   :  { %v2566_v61 = vmin.f32 %v1605_v27, 16.0 }
 0x67c   :  { %v1598_v56 = vpop.f32.mrf.mxu3 }
 0x67d   :  { %v1607_v1 = vmul.f32 2.1237322e-06, %v2566_v61  ;;  %v1618_v62 = vmul.f32 3.8918573e-05, %v2566_v61  ;;  %v2573_v6 = vadd.f32 %v1839_v49, %v1598_v56 }
 0x67f   :  { %v1608_v24 = vadd.f32 0.00028619796, %v1607_v1  ;;  %v1619_v45 = vadd.f32 0.001143296, %v1618_v62  ;;  %v2579_v31 = vmul.f32 0.70710677, %v2573_v6 }
 0x680   :  { %v1602_v51 = vmul.f32 0.5, %v2573_v6 }
 0x681   :  { %v1609_v7 = vmul.f32 %v1608_v24, %v2566_v61  ;;  %v1620_v32 = vmul.f32 %v1619_v45, %v2566_v61  ;;  %v1645_v4 = vmul.f32 %v2579_v31, %v2579_v31 }
 0x683   :  { %v1610_v13 = vadd.f32 0.0036580483, %v1609_v7  ;;  %v1621_v14 = vadd.f32 0.014752088, %v1620_v32  ;;  %v2591_v20 = vmin.f32 %v1645_v4, 16.0 }
 0x685   :  { %v1622_v16 = vmul.f32 %v1621_v14, %v2566_v61  ;;  %v1647_v55 = vmul.f32 2.1237322e-06, %v2591_v20  ;;  %v1658_v8 = vmul.f32 3.8918573e-05, %v2591_v20  ;;  %v1611_v17 = vmul.f32 %v1610_v13, %v2566_v61 }
 0x687   :  { %v1623_v22 = vadd.f32 0.112945676, %v1622_v16  ;;  %v1648_v39 = vadd.f32 0.00028619796, %v1647_v55  ;;  %v1659_v52 = vadd.f32 0.001143296, %v1658_v8 }
 0x688   :  { %v1612_v28 = vadd.f32 0.05243302, %v1611_v17 }
 0x689   :  { %v1624_v25 = vmul.f32 %v1623_v22, %v2566_v61  ;;  %v1649_v60 = vmul.f32 %v1648_v39, %v2591_v20  ;;  %v1660_v37 = vmul.f32 %v1659_v52, %v2591_v20 }
 0x68a   :  { %v1613_v0 = vmul.f32 %v1612_v28, %v2566_v61 }
 0x68b   :  { %v1625_v30 = vadd.f32 0.4994258, %v1624_v25  ;;  %v1661_v5 = vadd.f32 0.014752088, %v1660_v37  ;;  %v1650_v63 = vadd.f32 0.0036580483, %v1649_v60 }
 0x68c   :  { %v1614_v35 = vadd.f32 0.18741608, %v1613_v0 }
 0x68d   :  { %v1626_v26 = vmul.f32 %v1625_v30, %v2566_v61  ;;  %v1662_v42 = vmul.f32 %v1661_v5, %v2591_v20  ;;  %v1651_v9 = vmul.f32 %v1650_v63, %v2591_v20  ;;  %v1840_v30 = vld [vmem:[%s2665_s12] ss:$0 sm:$0xff]  ;;  %s1930_s12 = smov 128  }
 0x68e   :  { %v1615_v43 = vmul.f32 %v1614_v35, %v2566_v61 }
 0x68f   :  { %v1627_v38 = vadd.f32 1.0, %v1626_v26  ;;  %v1663_v36 = vadd.f32 0.112945676, %v1662_v42  ;;  %v1652_v15 = vadd.f32 0.05243302, %v1651_v9 }
 0x690   :  { %v1616_v27 = vadd.f32 1.1283791, %v1615_v43 }
 0x691   :  { %1883 = vrcp.f32 %v1627_v38  ;;  %v1664_v2 = vmul.f32 %v1663_v36, %v2591_v20  ;;  %v1639_v44 = vand.u32 2147483648, %v1627_v38  ;;  %v1653_v56 = vmul.f32 %v1652_v15, %v2591_v20 }
 0x692   :  { %v1637_v1 = vand.u32 2147483647, %v1627_v38  ;;  %vm1633_vm2 = vweird.f32 %v1627_v38  ;;  %v1617_v24 = vmul.f32 %v1616_v27, %v2556_v54 }
 0x693   :  { %v1665_v48 = vadd.f32 0.4994258, %v1664_v2  ;;  %v1640_v3 = vor.u32 1.1754944e-38, %v1639_v44  ;;  %v1654_v61 = vadd.f32 0.18741608, %v1653_v56 }
 0x694   :  { %vm1638_vm4 = vcmp.eq.f32.partialorder %v1637_v1, 8.507059e+37 }
 0x695   :  { %v1666_v49 = vmul.f32 %v1665_v48, %v2591_v20  ;;  %v1655_v4 = vmul.f32 %v1654_v61, %v2591_v20 }
 0x697   :  { %v1884_v33 = vpop.eup %1883  ;;  %v1667_v57 = vadd.f32 1.0, %v1666_v49  ;;  %v1656_v12 = vadd.f32 1.1283791, %v1655_v4 }
 0x698   :  { %v1629_v41 = vmul.f32 %v1884_v33, %v1627_v38  ;;  %vm1634_vm1 = vweird.f32 %v1884_v33 }
 0x699   :  { %1885 = vrcp.f32 %v1667_v57  ;;  %vm1635_vm3 = vmor %vm1633_vm2, %vm1634_vm1  ;;  %v1679_v55 = vand.u32 2147483648, %v1667_v57  ;;  %v1677_v17 = vand.u32 2147483647, %v1667_v57  ;;  %vm1673_vm6 = vweird.f32 %v1667_v57 }
 0x69a   :  { %v1630_v50 = vsub.f32 1.0, %v1629_v41  ;;  %v1657_v18 = vmul.f32 %v1656_v12, %v2579_v31 }
 0x69b   :  { %v1680_v39 = vor.u32 1.1754944e-38, %v1679_v55  ;;  %vm1678_vm8 = vcmp.eq.f32.partialorder %v1677_v17, 8.507059e+37 }
 0x69c   :  { %v1631_v47 = vmul.f32 %v1884_v33, %v1630_v50 }
 0x69e   :  { %v1632_v62 = vadd.f32 %v1884_v33, %v1631_v47 }
 0x69f   :  { %v1886_v7 = vpop.eup %1885 }
 0x6a0   :  { %v1636_v45 = vsel %vm1635_vm3, %v1884_v33, %v1632_v62  ;;  %v1669_v58 = vmul.f32 %v1886_v7, %v1667_v57  ;;  %vm1674_vm5 = vweird.f32 %v1886_v7 }
 0x6a1   :  { %v1641_v19 = vsel %vm1638_vm4, %v1640_v3, %v1636_v45  ;;  %vm1675_vm7 = vmor %vm1673_vm6, %vm1674_vm5 }
 0x6a2   :  { %v1642_v32 = vmul.f32 %v1641_v19, %v1617_v24  ;;  %v1670_v14 = vsub.f32 1.0, %v1669_v58 }
 0x6a4   :  { %v1790_v13 = vclamps-f32 %v1642_v32, 1.0  ;;  %v1671_v8 = vmul.f32 %v1886_v7, %v1670_v14 }
 0x6a6   :  { %v1685_v16 = vadd.f32 1.0, %v1790_v13  ;;  %v1672_v54 = vadd.f32 %v1886_v7, %v1671_v8 }
 0x6a8   :  { %v1687_v22 = vmul.f32 %v1685_v16, %v1601_v40  ;;  %v1676_v20 = vsel %vm1675_vm7, %v1886_v7, %v1672_v54 }
 0x6a9   :  { %v1681_v23 = vsel %vm1678_vm8, %v1680_v39, %v1676_v20 }
 0x6aa   :  { %1725 = vmatmul.f32.vlgmr.msrb.gmra.mxu0 %v1687_v22  ;;  %v1682_v25 = vmul.f32 %v1681_v23, %v1657_v18 }
 0x6ac   :  { %v1791_v52 = vclamps-f32 %v1682_v25, 1.0 }
 0x6ae   :  { %v1686_v59 = vadd.f32 1.0, %v1791_v52 }
 0x6b0   :  { %v1688_v28 = vmul.f32 %v1686_v59, %v1602_v51 }
 0x6b2   :  { %1728 = vmatmul.f32.gmra.mxu0 %v1688_v28 }
 0x727   :  { %v1726_v60 = vpop.f32.mrf.mxu0 }
 0x728   :  { %v1727_v37 = vadd.f32 %v1840_v30, %v1726_v60 }
 0x72a   :  { %v1732_v21 = vadd.f32 %v1727_v37, %v2510_v53 }
 0x72c   :  { %1734 = vst.msk [vmem:[#allocation2] sm:$0xff] %vm49_vm0, %v1732_v21 }
 0x72f   :  { %v1729_v6 = vpop.f32.mrf.mxu0 }
 0x730   :  { %v1730_v31 = vadd.f32 %v1840_v30, %v1729_v6 }
 0x732   :  { %v1733_v26 = vadd.f32 %v1730_v31, %v2518_v11 }
 0x734   :  { %1735 = vst.msk [vmem:[#allocation2 + $0x8] sm:$0xff] %vm49_vm0, %v1733_v26 }
 0x735   :  { %1748 = dma.vmem_to_hbm [thread:$0]  %s1741_s21, 256, %s1743_s1, [#allocation3], %s1930_s12, %s1930_s12, %s1931_s23  }
 0x736   :  { %1913 = dma.done.wait [#allocation3], 256  }
 0x737   :  { %1914 = vsyncadd [#allocation3], 4294967040 }
 0x738   :  { %1753 = vsyncpa [#allocation3], 1 }

</bundles_post_ra>
